<compile_context>
chip_gen: v7x
topology: tpu7x:2x2x1
jax: 0.10.0
libtpu: 0.0.40
codegen_flags: <defaults>
</compile_context>

<pallas_src>
import math

import jax
import jax.numpy as jnp
from jax.experimental import pallas as pl
from jax.experimental.pallas import tpu as pltpu

# ----- small synthetic FlauBERT config ---------------------------------------
VOCAB = 57
VOCAB_PAD = ((VOCAB + 7) // 8) * 8      # pad gather table rows to a multiple of 8
MAX_POS = 16
HIDDEN = 32
N_HEADS = 4
D_HEAD = HIDDEN // N_HEADS
FFN = 4 * HIDDEN
N_LAYERS = 2
EPS = 1e-12
MASK_NEG = 1e9                          # additive mask magnitude (exp underflows to exactly 0)


# ----- in-kernel helpers ------------------------------------------------------
def _layernorm(x, g, b):
    mu = jnp.mean(x, axis=-1, keepdims=True)
    var = jnp.mean(jnp.square(x - mu), axis=-1, keepdims=True)
    return (x - mu) * jax.lax.rsqrt(var + EPS) * g + b


# ----- fused Pallas kernel ----------------------------------------------------
def fused_encoder_kernel(ids_ref, mask_ref, word_ref, pos_ref, g0_ref, b0_ref,
                         wqkv_ref, bqkv_ref, wo_ref, bo_ref, g1_ref, be1_ref,
                         w1_ref, bf1_ref, w2_ref, bf2_ref, g2_ref, be2_ref,
                         o_ref):
    """Embedding + all transformer layers for the whole batch, fully VMEM-resident."""
    B, S = ids_ref.shape
    H = HIDDEN
    N = B * S

    # ---- embedding lookup fused in-kernel (one-hot matmul == gather, no HBM round-trip)
    ids = ids_ref[...]                                                    # (B, S) int32
    vocab_iota = jax.lax.broadcasted_iota(jnp.int32, (B, S, VOCAB_PAD), 2)
    onehot = (vocab_iota == ids[:, :, None]).astype(jnp.float32)          # (B, S, Vp)
    x = jnp.dot(onehot.reshape(N, VOCAB_PAD), word_ref[...],
                preferred_element_type=jnp.float32)                       # (B*S, H)
    x = (x.reshape(B, S, H) + pos_ref[0:S, :][None, :, :]).reshape(N, H)  # + positions
    x = _layernorm(x, g0_ref[...], b0_ref[...])                           # embedding LN

    # additive key mask, hoisted out of the layer loop
    maskf = mask_ref[...].astype(jnp.float32)                             # (B, S)
    mbias = (maskf - 1.0)[:, None, :] * MASK_NEG                          # (B, 1, S)

    for l in range(N_LAYERS):                 # static unroll; stacked weights indexed at l
        wqkv_l = wqkv_ref[l]                  # (H, 3H)  fused, lane-dense projection weight
        bqkv_l = bqkv_ref[l]                  # (1, 3H)
        wo_l = wo_ref[l]                      # (NH, dh, H)

        # --- fused lane-dense QKV projection: one (N,H)x(H,3H) MXU matmul ---
        qkv = jnp.dot(x, wqkv_l, preferred_element_type=jnp.float32) + bqkv_l   # (N, 3H)

        # --- per-head scores / softmax / context (single batch-dim einsums) ---
        attn = jnp.zeros((N, H), jnp.float32)
        for h in range(N_HEADS):
            lo = h * D_HEAD
            qh = qkv[:, lo:lo + D_HEAD].reshape(B, S, D_HEAD)             # (B,S,dh)
            kh = qkv[:, H + lo:H + lo + D_HEAD].reshape(B, S, D_HEAD)
            vh = qkv[:, 2 * H + lo:2 * H + lo + D_HEAD].reshape(B, S, D_HEAD)

            sc = jnp.einsum('bqd,bkd->bqk', qh, kh,
                            preferred_element_type=jnp.float32) + mbias   # (B,S,S)
            sc = sc - jnp.max(sc, axis=-1, keepdims=True)
            p = jnp.exp(sc)
            denom = jnp.maximum(jnp.sum(p, axis=-1, keepdims=True), 1e-30)
            p = p * pl.reciprocal(denom, approx=True)                     # EUP slot

            ctx = jnp.einsum('bqk,bkd->bqd', p, vh,
                             preferred_element_type=jnp.float32)          # (B,S,dh)
            # head reduction folded into the output-projection accumulation
            attn = attn + jnp.dot(ctx.reshape(N, D_HEAD), wo_l[h],
                                  preferred_element_type=jnp.float32)     # (N, H)
        attn = attn + bo_ref[l]
        x = _layernorm(x + attn, g1_ref[l], be1_ref[l])

        # --- feed-forward ---
        h1 = jnp.dot(x, w1_ref[l], preferred_element_type=jnp.float32) + bf1_ref[l]
        # TODO(synk): FlauBERT uses exact erf-GELU; tanh approximation used for safe TPU lowering.
        h1 = jax.nn.gelu(h1, approximate=True)
        h2 = jnp.dot(h1, w2_ref[l], preferred_element_type=jnp.float32) + bf2_ref[l]
        x = _layernorm(x + h2, g2_ref[l], be2_ref[l])

    # CLS rows only, written once as a dense (B, H) block.
    cls = x.reshape(B, S, H)[:, 0:1, :].reshape(B, H)
    o_ref[...] = cls * maskf[:, 0:1]


# ----- param packing (outside the jitted forward) ------------------------------
def prepare_params(params):
    """Pad the vocab table, fuse Q/K/V into (L,H,3H), fold 1/sqrt(dh) into Wq/bq,
    head-split Wo, and stack everything along a leading layer axis."""
    scale = 1.0 / math.sqrt(D_HEAD)
    word_pad = jnp.zeros((VOCAB_PAD, HIDDEN), jnp.float32).at[:VOCAB].set(params["word_emb"])

    wqkv, bqkv, wo, bo, g1, be1, w1, bf1, w2, bf2, g2, be2 = ([] for _ in range(12))
    for (lwq, lbq, lwk, lbk, lwv, lbv, lwo, lbo,
         lg1, lbe1, lw1, lbf1, lw2, lbf2, lg2, lbe2) in params["layers"]:
        wqkv.append(jnp.concatenate([lwq * scale, lwk, lwv], axis=1))     # (H, 3H)
        bqkv.append(jnp.concatenate([lbq * scale, lbk, lbv], axis=1))     # (1, 3H)
        wo.append(lwo.reshape(N_HEADS, D_HEAD, HIDDEN))                   # (NH, dh, H)
        bo.append(lbo)
        g1.append(lg1); be1.append(lbe1)
        w1.append(lw1); bf1.append(lbf1)
        w2.append(lw2); bf2.append(lbf2)
        g2.append(lg2); be2.append(lbe2)

    stack = lambda xs: jnp.stack(xs, axis=0)
    return [word_pad, params["pos_emb"], params["ln_emb_g"], params["ln_emb_b"],
            stack(wqkv), stack(bqkv), stack(wo), stack(bo),
            stack(g1), stack(be1), stack(w1), stack(bf1),
            stack(w2), stack(bf2), stack(g2), stack(be2)]


# ----- pallas_call wrapper ----------------------------------------------------
def _full_spec(arr):
    # whole array as one block; constant block index for the single grid step
    n = arr.ndim
    return pl.BlockSpec(arr.shape, lambda i, _n=n: (0,) * _n)


def flaubert_encoder(packed, input_ids, attention_mask):
    B, S = input_ids.shape
    inputs = [input_ids.astype(jnp.int32), attention_mask.astype(jnp.int32)] + list(packed)

    out = pl.pallas_call(
        fused_encoder_kernel,
        out_shape=jax.ShapeDtypeStruct((B, HIDDEN), jnp.float32),
        grid=(1,),                                   # batch folded into one grid step
        in_specs=[_full_spec(a) for a in inputs],
        out_specs=pl.BlockSpec((B, HIDDEN), lambda i: (0, 0)),
        compiler_params=pltpu.CompilerParams(
            dimension_semantics=("arbitrary",)),
    )(*inputs)
    # FlauBERTEncoder.forward returns last_hidden_state[:, 0, :]
    return out


# ----- parameters (deterministic synthetic init) ------------------------------
def init_params(key):
    def dense(k, fan_in, fan_out):
        kw, kb = jax.random.split(k)
        w = 0.02 * jax.random.normal(kw, (fan_in, fan_out), jnp.float32)
        b = 0.02 * jax.random.normal(kb, (1, fan_out), jnp.float32)
        return w, b

    keys = jax.random.split(key, 3 + N_LAYERS)
    word_emb = 0.02 * jax.random.normal(keys[0], (VOCAB, HIDDEN), jnp.float32)
    pos_emb = 0.02 * jax.random.normal(keys[1], (MAX_POS, HIDDEN), jnp.float32)
    ln_emb_g = jnp.ones((1, HIDDEN), jnp.float32)
    ln_emb_b = jnp.zeros((1, HIDDEN), jnp.float32)

    layers = []
    for l in range(N_LAYERS):
        ks = jax.random.split(keys[3 + l], 6)
        wq, bq = dense(ks[0], HIDDEN, HIDDEN)
        wk, bk = dense(ks[1], HIDDEN, HIDDEN)
        wv, bv = dense(ks[2], HIDDEN, HIDDEN)
        wo, bo = dense(ks[3], HIDDEN, HIDDEN)
        w1, bf1 = dense(ks[4], HIDDEN, FFN)
        w2, bf2 = dense(ks[5], FFN, HIDDEN)
        g1 = jnp.ones((1, HIDDEN), jnp.float32)
        be1 = jnp.zeros((1, HIDDEN), jnp.float32)
        g2 = jnp.ones((1, HIDDEN), jnp.float32)
        be2 = jnp.zeros((1, HIDDEN), jnp.float32)
        layers.append((wq, bq, wk, bk, wv, bv, wo, bo,
                       g1, be1, w1, bf1, w2, bf2, g2, be2))
    return dict(word_emb=word_emb, pos_emb=pos_emb,
                ln_emb_g=ln_emb_g, ln_emb_b=ln_emb_b, layers=layers)


if __name__ == "__main__":
    key = jax.random.PRNGKey(0)
    pkey, idkey = jax.random.split(key)
    params = init_params(pkey)
    packed = prepare_params(params)          # one-time packing, outside the hot path

    B, S = 2, 8
    input_ids = jax.random.randint(idkey, (B, S), 0, VOCAB, dtype=jnp.int32)
    attention_mask = jnp.array(
        [[1, 1, 1, 1, 1, 1, 1, 1],
         [1, 1, 1, 1, 1, 0, 0, 0]], dtype=jnp.int32)

    out = jax.jit(flaubert_encoder)(packed, input_ids, attention_mask)
    out = jax.block_until_ready(out)
    assert out.shape == (B, HIDDEN) and out.dtype == jnp.float32
    assert bool(jnp.all(jnp.isfinite(out)))
    print("KERNEL_OK")
</pallas_src>

<mosaic_0001>
module attributes {stable_mosaic.version = 11 : i64} {
  func.func @fused_encoder_kernel(%arg0: i32, %arg1: memref<2x8xi32, #tpu.memory_space<vmem>>, %arg2: memref<2x8xi32, #tpu.memory_space<vmem>>, %arg3: memref<64x32xf32, #tpu.memory_space<vmem>>, %arg4: memref<16x32xf32, #tpu.memory_space<vmem>>, %arg5: memref<1x32xf32, #tpu.memory_space<vmem>>, %arg6: memref<1x32xf32, #tpu.memory_space<vmem>>, %arg7: memref<2x32x96xf32, #tpu.memory_space<vmem>>, %arg8: memref<2x1x96xf32, #tpu.memory_space<vmem>>, %arg9: memref<2x4x8x32xf32, #tpu.memory_space<vmem>>, %arg10: memref<2x1x32xf32, #tpu.memory_space<vmem>>, %arg11: memref<2x1x32xf32, #tpu.memory_space<vmem>>, %arg12: memref<2x1x32xf32, #tpu.memory_space<vmem>>, %arg13: memref<2x32x128xf32, #tpu.memory_space<vmem>>, %arg14: memref<2x1x128xf32, #tpu.memory_space<vmem>>, %arg15: memref<2x128x32xf32, #tpu.memory_space<vmem>>, %arg16: memref<2x1x32xf32, #tpu.memory_space<vmem>>, %arg17: memref<2x1x32xf32, #tpu.memory_space<vmem>>, %arg18: memref<2x1x32xf32, #tpu.memory_space<vmem>>, %arg19: memref<2x32xf32, #tpu.memory_space<vmem>>) attributes {dimension_semantics = [#tpu.dimension_semantics<arbitrary>], iteration_bounds = array<i64: 1>, scalar_prefetch = 0 : i64, scratch_operands = 0 : i64, tpu.core_type = #tpu.core_type<tc>, window_params = [{pipeline_mode = #tpu.pipeline_mode<synchronous>, transform_indices = @transform_0, window_bounds = array<i64: 2, 8>}, {pipeline_mode = #tpu.pipeline_mode<synchronous>, transform_indices = @transform_1, window_bounds = array<i64: 2, 8>}, {pipeline_mode = #tpu.pipeline_mode<synchronous>, transform_indices = @transform_2, window_bounds = array<i64: 64, 32>}, {pipeline_mode = #tpu.pipeline_mode<synchronous>, transform_indices = @transform_3, window_bounds = array<i64: 16, 32>}, {pipeline_mode = #tpu.pipeline_mode<synchronous>, transform_indices = @transform_4, window_bounds = array<i64: 1, 32>}, {pipeline_mode = #tpu.pipeline_mode<synchronous>, transform_indices = @transform_5, window_bounds = array<i64: 1, 32>}, {pipeline_mode = #tpu.pipeline_mode<synchronous>, transform_indices = @transform_6, window_bounds = array<i64: 2, 32, 96>}, {pipeline_mode = #tpu.pipeline_mode<synchronous>, transform_indices = @transform_7, window_bounds = array<i64: 2, 1, 96>}, {pipeline_mode = #tpu.pipeline_mode<synchronous>, transform_indices = @transform_8, window_bounds = array<i64: 2, 4, 8, 32>}, {pipeline_mode = #tpu.pipeline_mode<synchronous>, transform_indices = @transform_9, window_bounds = array<i64: 2, 1, 32>}, {pipeline_mode = #tpu.pipeline_mode<synchronous>, transform_indices = @transform_10, window_bounds = array<i64: 2, 1, 32>}, {pipeline_mode = #tpu.pipeline_mode<synchronous>, transform_indices = @transform_11, window_bounds = array<i64: 2, 1, 32>}, {pipeline_mode = #tpu.pipeline_mode<synchronous>, transform_indices = @transform_12, window_bounds = array<i64: 2, 32, 128>}, {pipeline_mode = #tpu.pipeline_mode<synchronous>, transform_indices = @transform_13, window_bounds = array<i64: 2, 1, 128>}, {pipeline_mode = #tpu.pipeline_mode<synchronous>, transform_indices = @transform_14, window_bounds = array<i64: 2, 128, 32>}, {pipeline_mode = #tpu.pipeline_mode<synchronous>, transform_indices = @transform_15, window_bounds = array<i64: 2, 1, 32>}, {pipeline_mode = #tpu.pipeline_mode<synchronous>, transform_indices = @transform_16, window_bounds = array<i64: 2, 1, 32>}, {pipeline_mode = #tpu.pipeline_mode<synchronous>, transform_indices = @transform_17, window_bounds = array<i64: 2, 1, 32>}, {pipeline_mode = #tpu.pipeline_mode<synchronous>, transform_indices = @transform_18, window_bounds = array<i64: 2, 32>}]} {
    %c0 = arith.constant 0 : index
    %c0_0 = arith.constant 0 : index
    %0 = vector.load %arg1[%c0, %c0_0] : memref<2x8xi32, #tpu.memory_space<vmem>>, vector<2x8xi32>
    %1 = tpu.iota {dimensions = array<i32: 2>} : vector<2x8x64xi32>
    %2 = vector.shape_cast %0 : vector<2x8xi32> to vector<2x8x1xi32>
    %3 = vector.broadcast %2 : vector<2x8x1xi32> to vector<2x8x64xi32>
    %4 = arith.cmpi eq, %1, %3 : vector<2x8x64xi32>
    %5 = arith.extui %4 : vector<2x8x64xi1> to vector<2x8x64xi32>
    %6 = arith.sitofp %5 : vector<2x8x64xi32> to vector<2x8x64xf32>
    %7 = vector.shape_cast %6 : vector<2x8x64xf32> to vector<16x64xf32>
    %c0_1 = arith.constant 0 : index
    %c0_2 = arith.constant 0 : index
    %8 = vector.load %arg3[%c0_1, %c0_2] : memref<64x32xf32, #tpu.memory_space<vmem>>, vector<64x32xf32>
    %cst = arith.constant dense<0.000000e+00> : vector<16x32xf32>
    %9 = tpu.matmul %7, %8, %cst {dimension_numbers = #tpu.dot_dimension_numbers<[1], [0], [0], [1], [0, 0, 1, 1], [], []>} : vector<16x64xf32>, vector<64x32xf32>, vector<16x32xf32> -> vector<16x32xf32>
    %10 = vector.shape_cast %9 : vector<16x32xf32> to vector<2x8x32xf32>
    %c0_3 = arith.constant 0 : index
    %c0_4 = arith.constant 0 : index
    %11 = vector.load %arg4[%c0_3, %c0_4] : memref<16x32xf32, #tpu.memory_space<vmem>>, vector<8x32xf32>
    %12 = vector.shape_cast %11 : vector<8x32xf32> to vector<1x8x32xf32>
    %13 = vector.broadcast %12 : vector<1x8x32xf32> to vector<2x8x32xf32>
    %14 = arith.addf %10, %13 : vector<2x8x32xf32>
    %15 = vector.shape_cast %14 : vector<2x8x32xf32> to vector<16x32xf32>
    %c0_5 = arith.constant 0 : index
    %c0_6 = arith.constant 0 : index
    %16 = vector.load %arg5[%c0_5, %c0_6] : memref<1x32xf32, #tpu.memory_space<vmem>>, vector<1x32xf32>
    %c0_7 = arith.constant 0 : index
    %c0_8 = arith.constant 0 : index
    %17 = vector.load %arg6[%c0_7, %c0_8] : memref<1x32xf32, #tpu.memory_space<vmem>>, vector<1x32xf32>
    %cst_9 = arith.constant dense<0.000000e+00> : vector<16xf32>
    %18 = vector.multi_reduction <add>, %15, %cst_9 [1] : vector<16x32xf32> to vector<16xf32>
    %19 = vector.shape_cast %18 : vector<16xf32> to vector<16x1xf32>
    %cst_10 = arith.constant 3.200000e+01 : f32
    %20 = vector.broadcast %cst_10 : f32 to vector<16x1xf32>
    %21 = arith.divf %19, %20 : vector<16x1xf32>
    %22 = vector.broadcast %21 : vector<16x1xf32> to vector<16x32xf32>
    %23 = arith.subf %15, %22 : vector<16x32xf32>
    %24 = arith.mulf %23, %23 : vector<16x32xf32>
    %cst_11 = arith.constant dense<0.000000e+00> : vector<16xf32>
    %25 = vector.multi_reduction <add>, %24, %cst_11 [1] : vector<16x32xf32> to vector<16xf32>
    %26 = vector.shape_cast %25 : vector<16xf32> to vector<16x1xf32>
    %cst_12 = arith.constant 3.200000e+01 : f32
    %27 = vector.broadcast %cst_12 : f32 to vector<16x1xf32>
    %28 = arith.divf %26, %27 : vector<16x1xf32>
    %29 = vector.broadcast %21 : vector<16x1xf32> to vector<16x32xf32>
    %30 = arith.subf %15, %29 : vector<16x32xf32>
    %cst_13 = arith.constant 9.99999996E-13 : f32
    %31 = vector.broadcast %cst_13 : f32 to vector<16x1xf32>
    %32 = arith.addf %28, %31 : vector<16x1xf32>
    %33 = math.rsqrt %32 : vector<16x1xf32>
    %34 = vector.broadcast %33 : vector<16x1xf32> to vector<16x32xf32>
    %35 = arith.mulf %30, %34 : vector<16x32xf32>
    %36 = vector.broadcast %16 : vector<1x32xf32> to vector<16x32xf32>
    %37 = arith.mulf %35, %36 : vector<16x32xf32>
    %38 = vector.broadcast %17 : vector<1x32xf32> to vector<16x32xf32>
    %39 = arith.addf %37, %38 : vector<16x32xf32>
    %c0_14 = arith.constant 0 : index
    %c0_15 = arith.constant 0 : index
    %40 = vector.load %arg2[%c0_14, %c0_15] : memref<2x8xi32, #tpu.memory_space<vmem>>, vector<2x8xi32>
    %41 = arith.sitofp %40 : vector<2x8xi32> to vector<2x8xf32>
    %cst_16 = arith.constant 1.000000e+00 : f32
    %42 = vector.broadcast %cst_16 : f32 to vector<2x8xf32>
    %43 = arith.subf %41, %42 : vector<2x8xf32>
    %44 = vector.shape_cast %43 : vector<2x8xf32> to vector<2x1x8xf32>
    %cst_17 = arith.constant 1.000000e+09 : f32
    %45 = vector.broadcast %cst_17 : f32 to vector<2x1x8xf32>
    %46 = arith.mulf %44, %45 : vector<2x1x8xf32>
    %c0_18 = arith.constant 0 : index
    %c0_19 = arith.constant 0 : index
    %c0_20 = arith.constant 0 : index
    %47 = vector.load %arg7[%c0_18, %c0_19, %c0_20] : memref<2x32x96xf32, #tpu.memory_space<vmem>>, vector<1x32x96xf32>
    %48 = vector.shape_cast %47 : vector<1x32x96xf32> to vector<32x96xf32>
    %c0_21 = arith.constant 0 : index
    %c0_22 = arith.constant 0 : index
    %c0_23 = arith.constant 0 : index
    %49 = vector.load %arg8[%c0_21, %c0_22, %c0_23] : memref<2x1x96xf32, #tpu.memory_space<vmem>>, vector<1x1x96xf32>
    %50 = vector.shape_cast %49 : vector<1x1x96xf32> to vector<1x96xf32>
    %c0_24 = arith.constant 0 : index
    %c0_25 = arith.constant 0 : index
    %c0_26 = arith.constant 0 : index
    %c0_27 = arith.constant 0 : index
    %51 = vector.load %arg9[%c0_24, %c0_25, %c0_26, %c0_27] : memref<2x4x8x32xf32, #tpu.memory_space<vmem>>, vector<1x4x8x32xf32>
    %52 = vector.shape_cast %51 : vector<1x4x8x32xf32> to vector<4x8x32xf32>
    %cst_28 = arith.constant dense<0.000000e+00> : vector<16x96xf32>
    %53 = tpu.matmul %39, %48, %cst_28 {dimension_numbers = #tpu.dot_dimension_numbers<[1], [0], [0], [1], [0, 0, 1, 1], [], []>} : vector<16x32xf32>, vector<32x96xf32>, vector<16x96xf32> -> vector<16x96xf32>
    %54 = vector.broadcast %50 : vector<1x96xf32> to vector<16x96xf32>
    %55 = arith.addf %53, %54 : vector<16x96xf32>
    %cst_29 = arith.constant 0.000000e+00 : f32
    %56 = vector.broadcast %cst_29 : f32 to vector<16x32xf32>
    %57 = vector.extract_strided_slice %55 {offsets = [0, 0], sizes = [16, 8], strides = [1, 1]} : vector<16x96xf32> to vector<16x8xf32>
    %58 = vector.shape_cast %57 : vector<16x8xf32> to vector<2x8x8xf32>
    %59 = vector.extract_strided_slice %55 {offsets = [0, 32], sizes = [16, 8], strides = [1, 1]} : vector<16x96xf32> to vector<16x8xf32>
    %60 = vector.shape_cast %59 : vector<16x8xf32> to vector<2x8x8xf32>
    %61 = vector.extract_strided_slice %55 {offsets = [0, 64], sizes = [16, 8], strides = [1, 1]} : vector<16x96xf32> to vector<16x8xf32>
    %62 = vector.shape_cast %61 : vector<16x8xf32> to vector<2x8x8xf32>
    "tpu.trace_start"() <{level = 10 : i32, message = "bqd,bkd->bqk"}> : () -> ()
    %cst_30 = arith.constant dense<0.000000e+00> : vector<2x8x8xf32>
    %63 = tpu.matmul %58, %60, %cst_30 {dimension_numbers = #tpu.dot_dimension_numbers<[2], [2], [1], [1], [0, 0, 0, 1, 1, 1], [0], [0]>} : vector<2x8x8xf32>, vector<2x8x8xf32>, vector<2x8x8xf32> -> vector<2x8x8xf32>
    "tpu.trace_stop"() : () -> ()
    %64 = vector.broadcast %46 : vector<2x1x8xf32> to vector<2x8x8xf32>
    %65 = arith.addf %63, %64 : vector<2x8x8xf32>
    %cst_31 = arith.constant dense<0xFF800000> : vector<2x8xf32>
    %66 = vector.multi_reduction <maximumf>, %65, %cst_31 [2] : vector<2x8x8xf32> to vector<2x8xf32>
    %67 = vector.shape_cast %66 : vector<2x8xf32> to vector<2x8x1xf32>
    %68 = vector.broadcast %67 : vector<2x8x1xf32> to vector<2x8x8xf32>
    %69 = arith.subf %65, %68 : vector<2x8x8xf32>
    %70 = math.exp %69 : vector<2x8x8xf32>
    %cst_32 = arith.constant dense<0.000000e+00> : vector<2x8xf32>
    %71 = vector.multi_reduction <add>, %70, %cst_32 [2] : vector<2x8x8xf32> to vector<2x8xf32>
    %72 = vector.shape_cast %71 : vector<2x8xf32> to vector<2x8x1xf32>
    %cst_33 = arith.constant 1.000000e-30 : f32
    %73 = vector.broadcast %cst_33 : f32 to vector<2x8x1xf32>
    %74 = arith.maximumf %72, %73 : vector<2x8x1xf32>
    %75 = tpu.reciprocal %74 {approx = true} : vector<2x8x1xf32> -> vector<2x8x1xf32>
    %76 = vector.broadcast %75 : vector<2x8x1xf32> to vector<2x8x8xf32>
    %77 = arith.mulf %70, %76 : vector<2x8x8xf32>
    "tpu.trace_start"() <{level = 10 : i32, message = "bqk,bkd->bqd"}> : () -> ()
    %cst_34 = arith.constant dense<0.000000e+00> : vector<2x8x8xf32>
    %78 = tpu.matmul %77, %62, %cst_34 {dimension_numbers = #tpu.dot_dimension_numbers<[2], [1], [1], [2], [0, 0, 0, 1, 1, 2], [0], [0]>} : vector<2x8x8xf32>, vector<2x8x8xf32>, vector<2x8x8xf32> -> vector<2x8x8xf32>
    "tpu.trace_stop"() : () -> ()
    %79 = vector.shape_cast %78 : vector<2x8x8xf32> to vector<16x8xf32>
    %80 = vector.extract_strided_slice %52 {offsets = [0, 0, 0], sizes = [1, 8, 32], strides = [1, 1, 1]} : vector<4x8x32xf32> to vector<1x8x32xf32>
    %81 = vector.shape_cast %80 : vector<1x8x32xf32> to vector<8x32xf32>
    %cst_35 = arith.constant dense<0.000000e+00> : vector<16x32xf32>
    %82 = tpu.matmul %79, %81, %cst_35 {dimension_numbers = #tpu.dot_dimension_numbers<[1], [0], [0], [1], [0, 0, 1, 1], [], []>} : vector<16x8xf32>, vector<8x32xf32>, vector<16x32xf32> -> vector<16x32xf32>
    %83 = arith.addf %56, %82 : vector<16x32xf32>
    %84 = vector.extract_strided_slice %55 {offsets = [0, 8], sizes = [16, 8], strides = [1, 1]} : vector<16x96xf32> to vector<16x8xf32>
    %85 = vector.shape_cast %84 : vector<16x8xf32> to vector<2x8x8xf32>
    %86 = vector.extract_strided_slice %55 {offsets = [0, 40], sizes = [16, 8], strides = [1, 1]} : vector<16x96xf32> to vector<16x8xf32>
    %87 = vector.shape_cast %86 : vector<16x8xf32> to vector<2x8x8xf32>
    %88 = vector.extract_strided_slice %55 {offsets = [0, 72], sizes = [16, 8], strides = [1, 1]} : vector<16x96xf32> to vector<16x8xf32>
    %89 = vector.shape_cast %88 : vector<16x8xf32> to vector<2x8x8xf32>
    "tpu.trace_start"() <{level = 10 : i32, message = "bqd,bkd->bqk"}> : () -> ()
    %cst_36 = arith.constant dense<0.000000e+00> : vector<2x8x8xf32>
    %90 = tpu.matmul %85, %87, %cst_36 {dimension_numbers = #tpu.dot_dimension_numbers<[2], [2], [1], [1], [0, 0, 0, 1, 1, 1], [0], [0]>} : vector<2x8x8xf32>, vector<2x8x8xf32>, vector<2x8x8xf32> -> vector<2x8x8xf32>
    "tpu.trace_stop"() : () -> ()
    %91 = vector.broadcast %46 : vector<2x1x8xf32> to vector<2x8x8xf32>
    %92 = arith.addf %90, %91 : vector<2x8x8xf32>
    %cst_37 = arith.constant dense<0xFF800000> : vector<2x8xf32>
    %93 = vector.multi_reduction <maximumf>, %92, %cst_37 [2] : vector<2x8x8xf32> to vector<2x8xf32>
    %94 = vector.shape_cast %93 : vector<2x8xf32> to vector<2x8x1xf32>
    %95 = vector.broadcast %94 : vector<2x8x1xf32> to vector<2x8x8xf32>
    %96 = arith.subf %92, %95 : vector<2x8x8xf32>
    %97 = math.exp %96 : vector<2x8x8xf32>
    %cst_38 = arith.constant dense<0.000000e+00> : vector<2x8xf32>
    %98 = vector.multi_reduction <add>, %97, %cst_38 [2] : vector<2x8x8xf32> to vector<2x8xf32>
    %99 = vector.shape_cast %98 : vector<2x8xf32> to vector<2x8x1xf32>
    %cst_39 = arith.constant 1.000000e-30 : f32
    %100 = vector.broadcast %cst_39 : f32 to vector<2x8x1xf32>
    %101 = arith.maximumf %99, %100 : vector<2x8x1xf32>
    %102 = tpu.reciprocal %101 {approx = true} : vector<2x8x1xf32> -> vector<2x8x1xf32>
    %103 = vector.broadcast %102 : vector<2x8x1xf32> to vector<2x8x8xf32>
    %104 = arith.mulf %97, %103 : vector<2x8x8xf32>
    "tpu.trace_start"() <{level = 10 : i32, message = "bqk,bkd->bqd"}> : () -> ()
    %cst_40 = arith.constant dense<0.000000e+00> : vector<2x8x8xf32>
    %105 = tpu.matmul %104, %89, %cst_40 {dimension_numbers = #tpu.dot_dimension_numbers<[2], [1], [1], [2], [0, 0, 0, 1, 1, 2], [0], [0]>} : vector<2x8x8xf32>, vector<2x8x8xf32>, vector<2x8x8xf32> -> vector<2x8x8xf32>
    "tpu.trace_stop"() : () -> ()
    %106 = vector.shape_cast %105 : vector<2x8x8xf32> to vector<16x8xf32>
    %107 = vector.extract_strided_slice %52 {offsets = [1, 0, 0], sizes = [1, 8, 32], strides = [1, 1, 1]} : vector<4x8x32xf32> to vector<1x8x32xf32>
    %108 = vector.shape_cast %107 : vector<1x8x32xf32> to vector<8x32xf32>
    %cst_41 = arith.constant dense<0.000000e+00> : vector<16x32xf32>
    %109 = tpu.matmul %106, %108, %cst_41 {dimension_numbers = #tpu.dot_dimension_numbers<[1], [0], [0], [1], [0, 0, 1, 1], [], []>} : vector<16x8xf32>, vector<8x32xf32>, vector<16x32xf32> -> vector<16x32xf32>
    %110 = arith.addf %83, %109 : vector<16x32xf32>
    %111 = vector.extract_strided_slice %55 {offsets = [0, 16], sizes = [16, 8], strides = [1, 1]} : vector<16x96xf32> to vector<16x8xf32>
    %112 = vector.shape_cast %111 : vector<16x8xf32> to vector<2x8x8xf32>
    %113 = vector.extract_strided_slice %55 {offsets = [0, 48], sizes = [16, 8], strides = [1, 1]} : vector<16x96xf32> to vector<16x8xf32>
    %114 = vector.shape_cast %113 : vector<16x8xf32> to vector<2x8x8xf32>
    %115 = vector.extract_strided_slice %55 {offsets = [0, 80], sizes = [16, 8], strides = [1, 1]} : vector<16x96xf32> to vector<16x8xf32>
    %116 = vector.shape_cast %115 : vector<16x8xf32> to vector<2x8x8xf32>
    "tpu.trace_start"() <{level = 10 : i32, message = "bqd,bkd->bqk"}> : () -> ()
    %cst_42 = arith.constant dense<0.000000e+00> : vector<2x8x8xf32>
    %117 = tpu.matmul %112, %114, %cst_42 {dimension_numbers = #tpu.dot_dimension_numbers<[2], [2], [1], [1], [0, 0, 0, 1, 1, 1], [0], [0]>} : vector<2x8x8xf32>, vector<2x8x8xf32>, vector<2x8x8xf32> -> vector<2x8x8xf32>
    "tpu.trace_stop"() : () -> ()
    %118 = vector.broadcast %46 : vector<2x1x8xf32> to vector<2x8x8xf32>
    %119 = arith.addf %117, %118 : vector<2x8x8xf32>
    %cst_43 = arith.constant dense<0xFF800000> : vector<2x8xf32>
    %120 = vector.multi_reduction <maximumf>, %119, %cst_43 [2] : vector<2x8x8xf32> to vector<2x8xf32>
    %121 = vector.shape_cast %120 : vector<2x8xf32> to vector<2x8x1xf32>
    %122 = vector.broadcast %121 : vector<2x8x1xf32> to vector<2x8x8xf32>
    %123 = arith.subf %119, %122 : vector<2x8x8xf32>
    %124 = math.exp %123 : vector<2x8x8xf32>
    %cst_44 = arith.constant dense<0.000000e+00> : vector<2x8xf32>
    %125 = vector.multi_reduction <add>, %124, %cst_44 [2] : vector<2x8x8xf32> to vector<2x8xf32>
    %126 = vector.shape_cast %125 : vector<2x8xf32> to vector<2x8x1xf32>
    %cst_45 = arith.constant 1.000000e-30 : f32
    %127 = vector.broadcast %cst_45 : f32 to vector<2x8x1xf32>
    %128 = arith.maximumf %126, %127 : vector<2x8x1xf32>
    %129 = tpu.reciprocal %128 {approx = true} : vector<2x8x1xf32> -> vector<2x8x1xf32>
    %130 = vector.broadcast %129 : vector<2x8x1xf32> to vector<2x8x8xf32>
    %131 = arith.mulf %124, %130 : vector<2x8x8xf32>
    "tpu.trace_start"() <{level = 10 : i32, message = "bqk,bkd->bqd"}> : () -> ()
    %cst_46 = arith.constant dense<0.000000e+00> : vector<2x8x8xf32>
    %132 = tpu.matmul %131, %116, %cst_46 {dimension_numbers = #tpu.dot_dimension_numbers<[2], [1], [1], [2], [0, 0, 0, 1, 1, 2], [0], [0]>} : vector<2x8x8xf32>, vector<2x8x8xf32>, vector<2x8x8xf32> -> vector<2x8x8xf32>
    "tpu.trace_stop"() : () -> ()
    %133 = vector.shape_cast %132 : vector<2x8x8xf32> to vector<16x8xf32>
    %134 = vector.extract_strided_slice %52 {offsets = [2, 0, 0], sizes = [1, 8, 32], strides = [1, 1, 1]} : vector<4x8x32xf32> to vector<1x8x32xf32>
    %135 = vector.shape_cast %134 : vector<1x8x32xf32> to vector<8x32xf32>
    %cst_47 = arith.constant dense<0.000000e+00> : vector<16x32xf32>
    %136 = tpu.matmul %133, %135, %cst_47 {dimension_numbers = #tpu.dot_dimension_numbers<[1], [0], [0], [1], [0, 0, 1, 1], [], []>} : vector<16x8xf32>, vector<8x32xf32>, vector<16x32xf32> -> vector<16x32xf32>
    %137 = arith.addf %110, %136 : vector<16x32xf32>
    %138 = vector.extract_strided_slice %55 {offsets = [0, 24], sizes = [16, 8], strides = [1, 1]} : vector<16x96xf32> to vector<16x8xf32>
    %139 = vector.shape_cast %138 : vector<16x8xf32> to vector<2x8x8xf32>
    %140 = vector.extract_strided_slice %55 {offsets = [0, 56], sizes = [16, 8], strides = [1, 1]} : vector<16x96xf32> to vector<16x8xf32>
    %141 = vector.shape_cast %140 : vector<16x8xf32> to vector<2x8x8xf32>
    %142 = vector.extract_strided_slice %55 {offsets = [0, 88], sizes = [16, 8], strides = [1, 1]} : vector<16x96xf32> to vector<16x8xf32>
    %143 = vector.shape_cast %142 : vector<16x8xf32> to vector<2x8x8xf32>
    "tpu.trace_start"() <{level = 10 : i32, message = "bqd,bkd->bqk"}> : () -> ()
    %cst_48 = arith.constant dense<0.000000e+00> : vector<2x8x8xf32>
    %144 = tpu.matmul %139, %141, %cst_48 {dimension_numbers = #tpu.dot_dimension_numbers<[2], [2], [1], [1], [0, 0, 0, 1, 1, 1], [0], [0]>} : vector<2x8x8xf32>, vector<2x8x8xf32>, vector<2x8x8xf32> -> vector<2x8x8xf32>
    "tpu.trace_stop"() : () -> ()
    %145 = vector.broadcast %46 : vector<2x1x8xf32> to vector<2x8x8xf32>
    %146 = arith.addf %144, %145 : vector<2x8x8xf32>
    %cst_49 = arith.constant dense<0xFF800000> : vector<2x8xf32>
    %147 = vector.multi_reduction <maximumf>, %146, %cst_49 [2] : vector<2x8x8xf32> to vector<2x8xf32>
    %148 = vector.shape_cast %147 : vector<2x8xf32> to vector<2x8x1xf32>
    %149 = vector.broadcast %148 : vector<2x8x1xf32> to vector<2x8x8xf32>
    %150 = arith.subf %146, %149 : vector<2x8x8xf32>
    %151 = math.exp %150 : vector<2x8x8xf32>
    %cst_50 = arith.constant dense<0.000000e+00> : vector<2x8xf32>
    %152 = vector.multi_reduction <add>, %151, %cst_50 [2] : vector<2x8x8xf32> to vector<2x8xf32>
    %153 = vector.shape_cast %152 : vector<2x8xf32> to vector<2x8x1xf32>
    %cst_51 = arith.constant 1.000000e-30 : f32
    %154 = vector.broadcast %cst_51 : f32 to vector<2x8x1xf32>
    %155 = arith.maximumf %153, %154 : vector<2x8x1xf32>
    %156 = tpu.reciprocal %155 {approx = true} : vector<2x8x1xf32> -> vector<2x8x1xf32>
    %157 = vector.broadcast %156 : vector<2x8x1xf32> to vector<2x8x8xf32>
    %158 = arith.mulf %151, %157 : vector<2x8x8xf32>
    "tpu.trace_start"() <{level = 10 : i32, message = "bqk,bkd->bqd"}> : () -> ()
    %cst_52 = arith.constant dense<0.000000e+00> : vector<2x8x8xf32>
    %159 = tpu.matmul %158, %143, %cst_52 {dimension_numbers = #tpu.dot_dimension_numbers<[2], [1], [1], [2], [0, 0, 0, 1, 1, 2], [0], [0]>} : vector<2x8x8xf32>, vector<2x8x8xf32>, vector<2x8x8xf32> -> vector<2x8x8xf32>
    "tpu.trace_stop"() : () -> ()
    %160 = vector.shape_cast %159 : vector<2x8x8xf32> to vector<16x8xf32>
    %161 = vector.extract_strided_slice %52 {offsets = [3, 0, 0], sizes = [1, 8, 32], strides = [1, 1, 1]} : vector<4x8x32xf32> to vector<1x8x32xf32>
    %162 = vector.shape_cast %161 : vector<1x8x32xf32> to vector<8x32xf32>
    %cst_53 = arith.constant dense<0.000000e+00> : vector<16x32xf32>
    %163 = tpu.matmul %160, %162, %cst_53 {dimension_numbers = #tpu.dot_dimension_numbers<[1], [0], [0], [1], [0, 0, 1, 1], [], []>} : vector<16x8xf32>, vector<8x32xf32>, vector<16x32xf32> -> vector<16x32xf32>
    %164 = arith.addf %137, %163 : vector<16x32xf32>
    %c0_54 = arith.constant 0 : index
    %c0_55 = arith.constant 0 : index
    %c0_56 = arith.constant 0 : index
    %165 = vector.load %arg10[%c0_54, %c0_55, %c0_56] : memref<2x1x32xf32, #tpu.memory_space<vmem>>, vector<1x1x32xf32>
    %166 = vector.shape_cast %165 : vector<1x1x32xf32> to vector<1x32xf32>
    %167 = vector.broadcast %166 : vector<1x32xf32> to vector<16x32xf32>
    %168 = arith.addf %164, %167 : vector<16x32xf32>
    %169 = arith.addf %39, %168 : vector<16x32xf32>
    %c0_57 = arith.constant 0 : index
    %c0_58 = arith.constant 0 : index
    %c0_59 = arith.constant 0 : index
    %170 = vector.load %arg11[%c0_57, %c0_58, %c0_59] : memref<2x1x32xf32, #tpu.memory_space<vmem>>, vector<1x1x32xf32>
    %171 = vector.shape_cast %170 : vector<1x1x32xf32> to vector<1x32xf32>
    %c0_60 = arith.constant 0 : index
    %c0_61 = arith.constant 0 : index
    %c0_62 = arith.constant 0 : index
    %172 = vector.load %arg12[%c0_60, %c0_61, %c0_62] : memref<2x1x32xf32, #tpu.memory_space<vmem>>, vector<1x1x32xf32>
    %173 = vector.shape_cast %172 : vector<1x1x32xf32> to vector<1x32xf32>
    %cst_63 = arith.constant dense<0.000000e+00> : vector<16xf32>
    %174 = vector.multi_reduction <add>, %169, %cst_63 [1] : vector<16x32xf32> to vector<16xf32>
    %175 = vector.shape_cast %174 : vector<16xf32> to vector<16x1xf32>
    %cst_64 = arith.constant 3.200000e+01 : f32
    %176 = vector.broadcast %cst_64 : f32 to vector<16x1xf32>
    %177 = arith.divf %175, %176 : vector<16x1xf32>
    %178 = vector.broadcast %177 : vector<16x1xf32> to vector<16x32xf32>
    %179 = arith.subf %169, %178 : vector<16x32xf32>
    %180 = arith.mulf %179, %179 : vector<16x32xf32>
    %cst_65 = arith.constant dense<0.000000e+00> : vector<16xf32>
    %181 = vector.multi_reduction <add>, %180, %cst_65 [1] : vector<16x32xf32> to vector<16xf32>
    %182 = vector.shape_cast %181 : vector<16xf32> to vector<16x1xf32>
    %cst_66 = arith.constant 3.200000e+01 : f32
    %183 = vector.broadcast %cst_66 : f32 to vector<16x1xf32>
    %184 = arith.divf %182, %183 : vector<16x1xf32>
    %185 = vector.broadcast %177 : vector<16x1xf32> to vector<16x32xf32>
    %186 = arith.subf %169, %185 : vector<16x32xf32>
    %cst_67 = arith.constant 9.99999996E-13 : f32
    %187 = vector.broadcast %cst_67 : f32 to vector<16x1xf32>
    %188 = arith.addf %184, %187 : vector<16x1xf32>
    %189 = math.rsqrt %188 : vector<16x1xf32>
    %190 = vector.broadcast %189 : vector<16x1xf32> to vector<16x32xf32>
    %191 = arith.mulf %186, %190 : vector<16x32xf32>
    %192 = vector.broadcast %171 : vector<1x32xf32> to vector<16x32xf32>
    %193 = arith.mulf %191, %192 : vector<16x32xf32>
    %194 = vector.broadcast %173 : vector<1x32xf32> to vector<16x32xf32>
    %195 = arith.addf %193, %194 : vector<16x32xf32>
    %c0_68 = arith.constant 0 : index
    %c0_69 = arith.constant 0 : index
    %c0_70 = arith.constant 0 : index
    %196 = vector.load %arg13[%c0_68, %c0_69, %c0_70] : memref<2x32x128xf32, #tpu.memory_space<vmem>>, vector<1x32x128xf32>
    %197 = vector.shape_cast %196 : vector<1x32x128xf32> to vector<32x128xf32>
    %cst_71 = arith.constant dense<0.000000e+00> : vector<16x128xf32>
    %198 = tpu.matmul %195, %197, %cst_71 {dimension_numbers = #tpu.dot_dimension_numbers<[1], [0], [0], [1], [0, 0, 1, 1], [], []>} : vector<16x32xf32>, vector<32x128xf32>, vector<16x128xf32> -> vector<16x128xf32>
    %c0_72 = arith.constant 0 : index
    %c0_73 = arith.constant 0 : index
    %c0_74 = arith.constant 0 : index
    %199 = vector.load %arg14[%c0_72, %c0_73, %c0_74] : memref<2x1x128xf32, #tpu.memory_space<vmem>>, vector<1x1x128xf32>
    %200 = vector.shape_cast %199 : vector<1x1x128xf32> to vector<1x128xf32>
    %201 = vector.broadcast %200 : vector<1x128xf32> to vector<16x128xf32>
    %202 = arith.addf %198, %201 : vector<16x128xf32>
    %203 = arith.mulf %202, %202 : vector<16x128xf32>
    %204 = arith.mulf %202, %203 : vector<16x128xf32>
    %cst_75 = arith.constant 4.471500e-02 : f32
    %205 = vector.broadcast %cst_75 : f32 to vector<16x128xf32>
    %206 = arith.mulf %205, %204 : vector<16x128xf32>
    %207 = arith.addf %202, %206 : vector<16x128xf32>
    %cst_76 = arith.constant 0.797884583 : f32
    %208 = vector.broadcast %cst_76 : f32 to vector<16x128xf32>
    %209 = arith.mulf %208, %207 : vector<16x128xf32>
    %210 = math.tanh %209 : vector<16x128xf32>
    %cst_77 = arith.constant 1.000000e+00 : f32
    %211 = vector.broadcast %cst_77 : f32 to vector<16x128xf32>
    %212 = arith.addf %211, %210 : vector<16x128xf32>
    %cst_78 = arith.constant 5.000000e-01 : f32
    %213 = vector.broadcast %cst_78 : f32 to vector<16x128xf32>
    %214 = arith.mulf %213, %212 : vector<16x128xf32>
    %215 = arith.mulf %202, %214 : vector<16x128xf32>
    %c0_79 = arith.constant 0 : index
    %c0_80 = arith.constant 0 : index
    %c0_81 = arith.constant 0 : index
    %216 = vector.load %arg15[%c0_79, %c0_80, %c0_81] : memref<2x128x32xf32, #tpu.memory_space<vmem>>, vector<1x128x32xf32>
    %217 = vector.shape_cast %216 : vector<1x128x32xf32> to vector<128x32xf32>
    %cst_82 = arith.constant dense<0.000000e+00> : vector<16x32xf32>
    %218 = tpu.matmul %215, %217, %cst_82 {dimension_numbers = #tpu.dot_dimension_numbers<[1], [0], [0], [1], [0, 0, 1, 1], [], []>} : vector<16x128xf32>, vector<128x32xf32>, vector<16x32xf32> -> vector<16x32xf32>
    %c0_83 = arith.constant 0 : index
    %c0_84 = arith.constant 0 : index
    %c0_85 = arith.constant 0 : index
    %219 = vector.load %arg16[%c0_83, %c0_84, %c0_85] : memref<2x1x32xf32, #tpu.memory_space<vmem>>, vector<1x1x32xf32>
    %220 = vector.shape_cast %219 : vector<1x1x32xf32> to vector<1x32xf32>
    %221 = vector.broadcast %220 : vector<1x32xf32> to vector<16x32xf32>
    %222 = arith.addf %218, %221 : vector<16x32xf32>
    %223 = arith.addf %195, %222 : vector<16x32xf32>
    %c0_86 = arith.constant 0 : index
    %c0_87 = arith.constant 0 : index
    %c0_88 = arith.constant 0 : index
    %224 = vector.load %arg17[%c0_86, %c0_87, %c0_88] : memref<2x1x32xf32, #tpu.memory_space<vmem>>, vector<1x1x32xf32>
    %225 = vector.shape_cast %224 : vector<1x1x32xf32> to vector<1x32xf32>
    %c0_89 = arith.constant 0 : index
    %c0_90 = arith.constant 0 : index
    %c0_91 = arith.constant 0 : index
    %226 = vector.load %arg18[%c0_89, %c0_90, %c0_91] : memref<2x1x32xf32, #tpu.memory_space<vmem>>, vector<1x1x32xf32>
    %227 = vector.shape_cast %226 : vector<1x1x32xf32> to vector<1x32xf32>
    %cst_92 = arith.constant dense<0.000000e+00> : vector<16xf32>
    %228 = vector.multi_reduction <add>, %223, %cst_92 [1] : vector<16x32xf32> to vector<16xf32>
    %229 = vector.shape_cast %228 : vector<16xf32> to vector<16x1xf32>
    %cst_93 = arith.constant 3.200000e+01 : f32
    %230 = vector.broadcast %cst_93 : f32 to vector<16x1xf32>
    %231 = arith.divf %229, %230 : vector<16x1xf32>
    %232 = vector.broadcast %231 : vector<16x1xf32> to vector<16x32xf32>
    %233 = arith.subf %223, %232 : vector<16x32xf32>
    %234 = arith.mulf %233, %233 : vector<16x32xf32>
    %cst_94 = arith.constant dense<0.000000e+00> : vector<16xf32>
    %235 = vector.multi_reduction <add>, %234, %cst_94 [1] : vector<16x32xf32> to vector<16xf32>
    %236 = vector.shape_cast %235 : vector<16xf32> to vector<16x1xf32>
    %cst_95 = arith.constant 3.200000e+01 : f32
    %237 = vector.broadcast %cst_95 : f32 to vector<16x1xf32>
    %238 = arith.divf %236, %237 : vector<16x1xf32>
    %239 = vector.broadcast %231 : vector<16x1xf32> to vector<16x32xf32>
    %240 = arith.subf %223, %239 : vector<16x32xf32>
    %cst_96 = arith.constant 9.99999996E-13 : f32
    %241 = vector.broadcast %cst_96 : f32 to vector<16x1xf32>
    %242 = arith.addf %238, %241 : vector<16x1xf32>
    %243 = math.rsqrt %242 : vector<16x1xf32>
    %244 = vector.broadcast %243 : vector<16x1xf32> to vector<16x32xf32>
    %245 = arith.mulf %240, %244 : vector<16x32xf32>
    %246 = vector.broadcast %225 : vector<1x32xf32> to vector<16x32xf32>
    %247 = arith.mulf %245, %246 : vector<16x32xf32>
    %248 = vector.broadcast %227 : vector<1x32xf32> to vector<16x32xf32>
    %249 = arith.addf %247, %248 : vector<16x32xf32>
    %c1 = arith.constant 1 : index
    %c0_97 = arith.constant 0 : index
    %c0_98 = arith.constant 0 : index
    %250 = vector.load %arg7[%c1, %c0_97, %c0_98] : memref<2x32x96xf32, #tpu.memory_space<vmem>>, vector<1x32x96xf32>
    %251 = vector.shape_cast %250 : vector<1x32x96xf32> to vector<32x96xf32>
    %c1_99 = arith.constant 1 : index
    %c0_100 = arith.constant 0 : index
    %c0_101 = arith.constant 0 : index
    %252 = vector.load %arg8[%c1_99, %c0_100, %c0_101] : memref<2x1x96xf32, #tpu.memory_space<vmem>>, vector<1x1x96xf32>
    %253 = vector.shape_cast %252 : vector<1x1x96xf32> to vector<1x96xf32>
    %c1_102 = arith.constant 1 : index
    %c0_103 = arith.constant 0 : index
    %c0_104 = arith.constant 0 : index
    %c0_105 = arith.constant 0 : index
    %254 = vector.load %arg9[%c1_102, %c0_103, %c0_104, %c0_105] : memref<2x4x8x32xf32, #tpu.memory_space<vmem>>, vector<1x4x8x32xf32>
    %255 = vector.shape_cast %254 : vector<1x4x8x32xf32> to vector<4x8x32xf32>
    %cst_106 = arith.constant dense<0.000000e+00> : vector<16x96xf32>
    %256 = tpu.matmul %249, %251, %cst_106 {dimension_numbers = #tpu.dot_dimension_numbers<[1], [0], [0], [1], [0, 0, 1, 1], [], []>} : vector<16x32xf32>, vector<32x96xf32>, vector<16x96xf32> -> vector<16x96xf32>
    %257 = vector.broadcast %253 : vector<1x96xf32> to vector<16x96xf32>
    %258 = arith.addf %256, %257 : vector<16x96xf32>
    %cst_107 = arith.constant 0.000000e+00 : f32
    %259 = vector.broadcast %cst_107 : f32 to vector<16x32xf32>
    %260 = vector.extract_strided_slice %258 {offsets = [0, 0], sizes = [16, 8], strides = [1, 1]} : vector<16x96xf32> to vector<16x8xf32>
    %261 = vector.shape_cast %260 : vector<16x8xf32> to vector<2x8x8xf32>
    %262 = vector.extract_strided_slice %258 {offsets = [0, 32], sizes = [16, 8], strides = [1, 1]} : vector<16x96xf32> to vector<16x8xf32>
    %263 = vector.shape_cast %262 : vector<16x8xf32> to vector<2x8x8xf32>
    %264 = vector.extract_strided_slice %258 {offsets = [0, 64], sizes = [16, 8], strides = [1, 1]} : vector<16x96xf32> to vector<16x8xf32>
    %265 = vector.shape_cast %264 : vector<16x8xf32> to vector<2x8x8xf32>
    "tpu.trace_start"() <{level = 10 : i32, message = "bqd,bkd->bqk"}> : () -> ()
    %cst_108 = arith.constant dense<0.000000e+00> : vector<2x8x8xf32>
    %266 = tpu.matmul %261, %263, %cst_108 {dimension_numbers = #tpu.dot_dimension_numbers<[2], [2], [1], [1], [0, 0, 0, 1, 1, 1], [0], [0]>} : vector<2x8x8xf32>, vector<2x8x8xf32>, vector<2x8x8xf32> -> vector<2x8x8xf32>
    "tpu.trace_stop"() : () -> ()
    %267 = vector.broadcast %46 : vector<2x1x8xf32> to vector<2x8x8xf32>
    %268 = arith.addf %266, %267 : vector<2x8x8xf32>
    %cst_109 = arith.constant dense<0xFF800000> : vector<2x8xf32>
    %269 = vector.multi_reduction <maximumf>, %268, %cst_109 [2] : vector<2x8x8xf32> to vector<2x8xf32>
    %270 = vector.shape_cast %269 : vector<2x8xf32> to vector<2x8x1xf32>
    %271 = vector.broadcast %270 : vector<2x8x1xf32> to vector<2x8x8xf32>
    %272 = arith.subf %268, %271 : vector<2x8x8xf32>
    %273 = math.exp %272 : vector<2x8x8xf32>
    %cst_110 = arith.constant dense<0.000000e+00> : vector<2x8xf32>
    %274 = vector.multi_reduction <add>, %273, %cst_110 [2] : vector<2x8x8xf32> to vector<2x8xf32>
    %275 = vector.shape_cast %274 : vector<2x8xf32> to vector<2x8x1xf32>
    %cst_111 = arith.constant 1.000000e-30 : f32
    %276 = vector.broadcast %cst_111 : f32 to vector<2x8x1xf32>
    %277 = arith.maximumf %275, %276 : vector<2x8x1xf32>
    %278 = tpu.reciprocal %277 {approx = true} : vector<2x8x1xf32> -> vector<2x8x1xf32>
    %279 = vector.broadcast %278 : vector<2x8x1xf32> to vector<2x8x8xf32>
    %280 = arith.mulf %273, %279 : vector<2x8x8xf32>
    "tpu.trace_start"() <{level = 10 : i32, message = "bqk,bkd->bqd"}> : () -> ()
    %cst_112 = arith.constant dense<0.000000e+00> : vector<2x8x8xf32>
    %281 = tpu.matmul %280, %265, %cst_112 {dimension_numbers = #tpu.dot_dimension_numbers<[2], [1], [1], [2], [0, 0, 0, 1, 1, 2], [0], [0]>} : vector<2x8x8xf32>, vector<2x8x8xf32>, vector<2x8x8xf32> -> vector<2x8x8xf32>
    "tpu.trace_stop"() : () -> ()
    %282 = vector.shape_cast %281 : vector<2x8x8xf32> to vector<16x8xf32>
    %283 = vector.extract_strided_slice %255 {offsets = [0, 0, 0], sizes = [1, 8, 32], strides = [1, 1, 1]} : vector<4x8x32xf32> to vector<1x8x32xf32>
    %284 = vector.shape_cast %283 : vector<1x8x32xf32> to vector<8x32xf32>
    %cst_113 = arith.constant dense<0.000000e+00> : vector<16x32xf32>
    %285 = tpu.matmul %282, %284, %cst_113 {dimension_numbers = #tpu.dot_dimension_numbers<[1], [0], [0], [1], [0, 0, 1, 1], [], []>} : vector<16x8xf32>, vector<8x32xf32>, vector<16x32xf32> -> vector<16x32xf32>
    %286 = arith.addf %259, %285 : vector<16x32xf32>
    %287 = vector.extract_strided_slice %258 {offsets = [0, 8], sizes = [16, 8], strides = [1, 1]} : vector<16x96xf32> to vector<16x8xf32>
    %288 = vector.shape_cast %287 : vector<16x8xf32> to vector<2x8x8xf32>
    %289 = vector.extract_strided_slice %258 {offsets = [0, 40], sizes = [16, 8], strides = [1, 1]} : vector<16x96xf32> to vector<16x8xf32>
    %290 = vector.shape_cast %289 : vector<16x8xf32> to vector<2x8x8xf32>
    %291 = vector.extract_strided_slice %258 {offsets = [0, 72], sizes = [16, 8], strides = [1, 1]} : vector<16x96xf32> to vector<16x8xf32>
    %292 = vector.shape_cast %291 : vector<16x8xf32> to vector<2x8x8xf32>
    "tpu.trace_start"() <{level = 10 : i32, message = "bqd,bkd->bqk"}> : () -> ()
    %cst_114 = arith.constant dense<0.000000e+00> : vector<2x8x8xf32>
    %293 = tpu.matmul %288, %290, %cst_114 {dimension_numbers = #tpu.dot_dimension_numbers<[2], [2], [1], [1], [0, 0, 0, 1, 1, 1], [0], [0]>} : vector<2x8x8xf32>, vector<2x8x8xf32>, vector<2x8x8xf32> -> vector<2x8x8xf32>
    "tpu.trace_stop"() : () -> ()
    %294 = vector.broadcast %46 : vector<2x1x8xf32> to vector<2x8x8xf32>
    %295 = arith.addf %293, %294 : vector<2x8x8xf32>
    %cst_115 = arith.constant dense<0xFF800000> : vector<2x8xf32>
    %296 = vector.multi_reduction <maximumf>, %295, %cst_115 [2] : vector<2x8x8xf32> to vector<2x8xf32>
    %297 = vector.shape_cast %296 : vector<2x8xf32> to vector<2x8x1xf32>
    %298 = vector.broadcast %297 : vector<2x8x1xf32> to vector<2x8x8xf32>
    %299 = arith.subf %295, %298 : vector<2x8x8xf32>
    %300 = math.exp %299 : vector<2x8x8xf32>
    %cst_116 = arith.constant dense<0.000000e+00> : vector<2x8xf32>
    %301 = vector.multi_reduction <add>, %300, %cst_116 [2] : vector<2x8x8xf32> to vector<2x8xf32>
    %302 = vector.shape_cast %301 : vector<2x8xf32> to vector<2x8x1xf32>
    %cst_117 = arith.constant 1.000000e-30 : f32
    %303 = vector.broadcast %cst_117 : f32 to vector<2x8x1xf32>
    %304 = arith.maximumf %302, %303 : vector<2x8x1xf32>
    %305 = tpu.reciprocal %304 {approx = true} : vector<2x8x1xf32> -> vector<2x8x1xf32>
    %306 = vector.broadcast %305 : vector<2x8x1xf32> to vector<2x8x8xf32>
    %307 = arith.mulf %300, %306 : vector<2x8x8xf32>
    "tpu.trace_start"() <{level = 10 : i32, message = "bqk,bkd->bqd"}> : () -> ()
    %cst_118 = arith.constant dense<0.000000e+00> : vector<2x8x8xf32>
    %308 = tpu.matmul %307, %292, %cst_118 {dimension_numbers = #tpu.dot_dimension_numbers<[2], [1], [1], [2], [0, 0, 0, 1, 1, 2], [0], [0]>} : vector<2x8x8xf32>, vector<2x8x8xf32>, vector<2x8x8xf32> -> vector<2x8x8xf32>
    "tpu.trace_stop"() : () -> ()
    %309 = vector.shape_cast %308 : vector<2x8x8xf32> to vector<16x8xf32>
    %310 = vector.extract_strided_slice %255 {offsets = [1, 0, 0], sizes = [1, 8, 32], strides = [1, 1, 1]} : vector<4x8x32xf32> to vector<1x8x32xf32>
    %311 = vector.shape_cast %310 : vector<1x8x32xf32> to vector<8x32xf32>
    %cst_119 = arith.constant dense<0.000000e+00> : vector<16x32xf32>
    %312 = tpu.matmul %309, %311, %cst_119 {dimension_numbers = #tpu.dot_dimension_numbers<[1], [0], [0], [1], [0, 0, 1, 1], [], []>} : vector<16x8xf32>, vector<8x32xf32>, vector<16x32xf32> -> vector<16x32xf32>
    %313 = arith.addf %286, %312 : vector<16x32xf32>
    %314 = vector.extract_strided_slice %258 {offsets = [0, 16], sizes = [16, 8], strides = [1, 1]} : vector<16x96xf32> to vector<16x8xf32>
    %315 = vector.shape_cast %314 : vector<16x8xf32> to vector<2x8x8xf32>
    %316 = vector.extract_strided_slice %258 {offsets = [0, 48], sizes = [16, 8], strides = [1, 1]} : vector<16x96xf32> to vector<16x8xf32>
    %317 = vector.shape_cast %316 : vector<16x8xf32> to vector<2x8x8xf32>
    %318 = vector.extract_strided_slice %258 {offsets = [0, 80], sizes = [16, 8], strides = [1, 1]} : vector<16x96xf32> to vector<16x8xf32>
    %319 = vector.shape_cast %318 : vector<16x8xf32> to vector<2x8x8xf32>
    "tpu.trace_start"() <{level = 10 : i32, message = "bqd,bkd->bqk"}> : () -> ()
    %cst_120 = arith.constant dense<0.000000e+00> : vector<2x8x8xf32>
    %320 = tpu.matmul %315, %317, %cst_120 {dimension_numbers = #tpu.dot_dimension_numbers<[2], [2], [1], [1], [0, 0, 0, 1, 1, 1], [0], [0]>} : vector<2x8x8xf32>, vector<2x8x8xf32>, vector<2x8x8xf32> -> vector<2x8x8xf32>
    "tpu.trace_stop"() : () -> ()
    %321 = vector.broadcast %46 : vector<2x1x8xf32> to vector<2x8x8xf32>
    %322 = arith.addf %320, %321 : vector<2x8x8xf32>
    %cst_121 = arith.constant dense<0xFF800000> : vector<2x8xf32>
    %323 = vector.multi_reduction <maximumf>, %322, %cst_121 [2] : vector<2x8x8xf32> to vector<2x8xf32>
    %324 = vector.shape_cast %323 : vector<2x8xf32> to vector<2x8x1xf32>
    %325 = vector.broadcast %324 : vector<2x8x1xf32> to vector<2x8x8xf32>
    %326 = arith.subf %322, %325 : vector<2x8x8xf32>
    %327 = math.exp %326 : vector<2x8x8xf32>
    %cst_122 = arith.constant dense<0.000000e+00> : vector<2x8xf32>
    %328 = vector.multi_reduction <add>, %327, %cst_122 [2] : vector<2x8x8xf32> to vector<2x8xf32>
    %329 = vector.shape_cast %328 : vector<2x8xf32> to vector<2x8x1xf32>
    %cst_123 = arith.constant 1.000000e-30 : f32
    %330 = vector.broadcast %cst_123 : f32 to vector<2x8x1xf32>
    %331 = arith.maximumf %329, %330 : vector<2x8x1xf32>
    %332 = tpu.reciprocal %331 {approx = true} : vector<2x8x1xf32> -> vector<2x8x1xf32>
    %333 = vector.broadcast %332 : vector<2x8x1xf32> to vector<2x8x8xf32>
    %334 = arith.mulf %327, %333 : vector<2x8x8xf32>
    "tpu.trace_start"() <{level = 10 : i32, message = "bqk,bkd->bqd"}> : () -> ()
    %cst_124 = arith.constant dense<0.000000e+00> : vector<2x8x8xf32>
    %335 = tpu.matmul %334, %319, %cst_124 {dimension_numbers = #tpu.dot_dimension_numbers<[2], [1], [1], [2], [0, 0, 0, 1, 1, 2], [0], [0]>} : vector<2x8x8xf32>, vector<2x8x8xf32>, vector<2x8x8xf32> -> vector<2x8x8xf32>
    "tpu.trace_stop"() : () -> ()
    %336 = vector.shape_cast %335 : vector<2x8x8xf32> to vector<16x8xf32>
    %337 = vector.extract_strided_slice %255 {offsets = [2, 0, 0], sizes = [1, 8, 32], strides = [1, 1, 1]} : vector<4x8x32xf32> to vector<1x8x32xf32>
    %338 = vector.shape_cast %337 : vector<1x8x32xf32> to vector<8x32xf32>
    %cst_125 = arith.constant dense<0.000000e+00> : vector<16x32xf32>
    %339 = tpu.matmul %336, %338, %cst_125 {dimension_numbers = #tpu.dot_dimension_numbers<[1], [0], [0], [1], [0, 0, 1, 1], [], []>} : vector<16x8xf32>, vector<8x32xf32>, vector<16x32xf32> -> vector<16x32xf32>
    %340 = arith.addf %313, %339 : vector<16x32xf32>
    %341 = vector.extract_strided_slice %258 {offsets = [0, 24], sizes = [16, 8], strides = [1, 1]} : vector<16x96xf32> to vector<16x8xf32>
    %342 = vector.shape_cast %341 : vector<16x8xf32> to vector<2x8x8xf32>
    %343 = vector.extract_strided_slice %258 {offsets = [0, 56], sizes = [16, 8], strides = [1, 1]} : vector<16x96xf32> to vector<16x8xf32>
    %344 = vector.shape_cast %343 : vector<16x8xf32> to vector<2x8x8xf32>
    %345 = vector.extract_strided_slice %258 {offsets = [0, 88], sizes = [16, 8], strides = [1, 1]} : vector<16x96xf32> to vector<16x8xf32>
    %346 = vector.shape_cast %345 : vector<16x8xf32> to vector<2x8x8xf32>
    "tpu.trace_start"() <{level = 10 : i32, message = "bqd,bkd->bqk"}> : () -> ()
    %cst_126 = arith.constant dense<0.000000e+00> : vector<2x8x8xf32>
    %347 = tpu.matmul %342, %344, %cst_126 {dimension_numbers = #tpu.dot_dimension_numbers<[2], [2], [1], [1], [0, 0, 0, 1, 1, 1], [0], [0]>} : vector<2x8x8xf32>, vector<2x8x8xf32>, vector<2x8x8xf32> -> vector<2x8x8xf32>
    "tpu.trace_stop"() : () -> ()
    %348 = vector.broadcast %46 : vector<2x1x8xf32> to vector<2x8x8xf32>
    %349 = arith.addf %347, %348 : vector<2x8x8xf32>
    %cst_127 = arith.constant dense<0xFF800000> : vector<2x8xf32>
    %350 = vector.multi_reduction <maximumf>, %349, %cst_127 [2] : vector<2x8x8xf32> to vector<2x8xf32>
    %351 = vector.shape_cast %350 : vector<2x8xf32> to vector<2x8x1xf32>
    %352 = vector.broadcast %351 : vector<2x8x1xf32> to vector<2x8x8xf32>
    %353 = arith.subf %349, %352 : vector<2x8x8xf32>
    %354 = math.exp %353 : vector<2x8x8xf32>
    %cst_128 = arith.constant dense<0.000000e+00> : vector<2x8xf32>
    %355 = vector.multi_reduction <add>, %354, %cst_128 [2] : vector<2x8x8xf32> to vector<2x8xf32>
    %356 = vector.shape_cast %355 : vector<2x8xf32> to vector<2x8x1xf32>
    %cst_129 = arith.constant 1.000000e-30 : f32
    %357 = vector.broadcast %cst_129 : f32 to vector<2x8x1xf32>
    %358 = arith.maximumf %356, %357 : vector<2x8x1xf32>
    %359 = tpu.reciprocal %358 {approx = true} : vector<2x8x1xf32> -> vector<2x8x1xf32>
    %360 = vector.broadcast %359 : vector<2x8x1xf32> to vector<2x8x8xf32>
    %361 = arith.mulf %354, %360 : vector<2x8x8xf32>
    "tpu.trace_start"() <{level = 10 : i32, message = "bqk,bkd->bqd"}> : () -> ()
    %cst_130 = arith.constant dense<0.000000e+00> : vector<2x8x8xf32>
    %362 = tpu.matmul %361, %346, %cst_130 {dimension_numbers = #tpu.dot_dimension_numbers<[2], [1], [1], [2], [0, 0, 0, 1, 1, 2], [0], [0]>} : vector<2x8x8xf32>, vector<2x8x8xf32>, vector<2x8x8xf32> -> vector<2x8x8xf32>
    "tpu.trace_stop"() : () -> ()
    %363 = vector.shape_cast %362 : vector<2x8x8xf32> to vector<16x8xf32>
    %364 = vector.extract_strided_slice %255 {offsets = [3, 0, 0], sizes = [1, 8, 32], strides = [1, 1, 1]} : vector<4x8x32xf32> to vector<1x8x32xf32>
    %365 = vector.shape_cast %364 : vector<1x8x32xf32> to vector<8x32xf32>
    %cst_131 = arith.constant dense<0.000000e+00> : vector<16x32xf32>
    %366 = tpu.matmul %363, %365, %cst_131 {dimension_numbers = #tpu.dot_dimension_numbers<[1], [0], [0], [1], [0, 0, 1, 1], [], []>} : vector<16x8xf32>, vector<8x32xf32>, vector<16x32xf32> -> vector<16x32xf32>
    %367 = arith.addf %340, %366 : vector<16x32xf32>
    %c1_132 = arith.constant 1 : index
    %c0_133 = arith.constant 0 : index
    %c0_134 = arith.constant 0 : index
    %368 = vector.load %arg10[%c1_132, %c0_133, %c0_134] : memref<2x1x32xf32, #tpu.memory_space<vmem>>, vector<1x1x32xf32>
    %369 = vector.shape_cast %368 : vector<1x1x32xf32> to vector<1x32xf32>
    %370 = vector.broadcast %369 : vector<1x32xf32> to vector<16x32xf32>
    %371 = arith.addf %367, %370 : vector<16x32xf32>
    %372 = arith.addf %249, %371 : vector<16x32xf32>
    %c1_135 = arith.constant 1 : index
    %c0_136 = arith.constant 0 : index
    %c0_137 = arith.constant 0 : index
    %373 = vector.load %arg11[%c1_135, %c0_136, %c0_137] : memref<2x1x32xf32, #tpu.memory_space<vmem>>, vector<1x1x32xf32>
    %374 = vector.shape_cast %373 : vector<1x1x32xf32> to vector<1x32xf32>
    %c1_138 = arith.constant 1 : index
    %c0_139 = arith.constant 0 : index
    %c0_140 = arith.constant 0 : index
    %375 = vector.load %arg12[%c1_138, %c0_139, %c0_140] : memref<2x1x32xf32, #tpu.memory_space<vmem>>, vector<1x1x32xf32>
    %376 = vector.shape_cast %375 : vector<1x1x32xf32> to vector<1x32xf32>
    %cst_141 = arith.constant dense<0.000000e+00> : vector<16xf32>
    %377 = vector.multi_reduction <add>, %372, %cst_141 [1] : vector<16x32xf32> to vector<16xf32>
    %378 = vector.shape_cast %377 : vector<16xf32> to vector<16x1xf32>
    %cst_142 = arith.constant 3.200000e+01 : f32
    %379 = vector.broadcast %cst_142 : f32 to vector<16x1xf32>
    %380 = arith.divf %378, %379 : vector<16x1xf32>
    %381 = vector.broadcast %380 : vector<16x1xf32> to vector<16x32xf32>
    %382 = arith.subf %372, %381 : vector<16x32xf32>
    %383 = arith.mulf %382, %382 : vector<16x32xf32>
    %cst_143 = arith.constant dense<0.000000e+00> : vector<16xf32>
    %384 = vector.multi_reduction <add>, %383, %cst_143 [1] : vector<16x32xf32> to vector<16xf32>
    %385 = vector.shape_cast %384 : vector<16xf32> to vector<16x1xf32>
    %cst_144 = arith.constant 3.200000e+01 : f32
    %386 = vector.broadcast %cst_144 : f32 to vector<16x1xf32>
    %387 = arith.divf %385, %386 : vector<16x1xf32>
    %388 = vector.broadcast %380 : vector<16x1xf32> to vector<16x32xf32>
    %389 = arith.subf %372, %388 : vector<16x32xf32>
    %cst_145 = arith.constant 9.99999996E-13 : f32
    %390 = vector.broadcast %cst_145 : f32 to vector<16x1xf32>
    %391 = arith.addf %387, %390 : vector<16x1xf32>
    %392 = math.rsqrt %391 : vector<16x1xf32>
    %393 = vector.broadcast %392 : vector<16x1xf32> to vector<16x32xf32>
    %394 = arith.mulf %389, %393 : vector<16x32xf32>
    %395 = vector.broadcast %374 : vector<1x32xf32> to vector<16x32xf32>
    %396 = arith.mulf %394, %395 : vector<16x32xf32>
    %397 = vector.broadcast %376 : vector<1x32xf32> to vector<16x32xf32>
    %398 = arith.addf %396, %397 : vector<16x32xf32>
    %c1_146 = arith.constant 1 : index
    %c0_147 = arith.constant 0 : index
    %c0_148 = arith.constant 0 : index
    %399 = vector.load %arg13[%c1_146, %c0_147, %c0_148] : memref<2x32x128xf32, #tpu.memory_space<vmem>>, vector<1x32x128xf32>
    %400 = vector.shape_cast %399 : vector<1x32x128xf32> to vector<32x128xf32>
    %cst_149 = arith.constant dense<0.000000e+00> : vector<16x128xf32>
    %401 = tpu.matmul %398, %400, %cst_149 {dimension_numbers = #tpu.dot_dimension_numbers<[1], [0], [0], [1], [0, 0, 1, 1], [], []>} : vector<16x32xf32>, vector<32x128xf32>, vector<16x128xf32> -> vector<16x128xf32>
    %c1_150 = arith.constant 1 : index
    %c0_151 = arith.constant 0 : index
    %c0_152 = arith.constant 0 : index
    %402 = vector.load %arg14[%c1_150, %c0_151, %c0_152] : memref<2x1x128xf32, #tpu.memory_space<vmem>>, vector<1x1x128xf32>
    %403 = vector.shape_cast %402 : vector<1x1x128xf32> to vector<1x128xf32>
    %404 = vector.broadcast %403 : vector<1x128xf32> to vector<16x128xf32>
    %405 = arith.addf %401, %404 : vector<16x128xf32>
    %406 = arith.mulf %405, %405 : vector<16x128xf32>
    %407 = arith.mulf %405, %406 : vector<16x128xf32>
    %cst_153 = arith.constant 4.471500e-02 : f32
    %408 = vector.broadcast %cst_153 : f32 to vector<16x128xf32>
    %409 = arith.mulf %408, %407 : vector<16x128xf32>
    %410 = arith.addf %405, %409 : vector<16x128xf32>
    %cst_154 = arith.constant 0.797884583 : f32
    %411 = vector.broadcast %cst_154 : f32 to vector<16x128xf32>
    %412 = arith.mulf %411, %410 : vector<16x128xf32>
    %413 = math.tanh %412 : vector<16x128xf32>
    %cst_155 = arith.constant 1.000000e+00 : f32
    %414 = vector.broadcast %cst_155 : f32 to vector<16x128xf32>
    %415 = arith.addf %414, %413 : vector<16x128xf32>
    %cst_156 = arith.constant 5.000000e-01 : f32
    %416 = vector.broadcast %cst_156 : f32 to vector<16x128xf32>
    %417 = arith.mulf %416, %415 : vector<16x128xf32>
    %418 = arith.mulf %405, %417 : vector<16x128xf32>
    %c1_157 = arith.constant 1 : index
    %c0_158 = arith.constant 0 : index
    %c0_159 = arith.constant 0 : index
    %419 = vector.load %arg15[%c1_157, %c0_158, %c0_159] : memref<2x128x32xf32, #tpu.memory_space<vmem>>, vector<1x128x32xf32>
    %420 = vector.shape_cast %419 : vector<1x128x32xf32> to vector<128x32xf32>
    %cst_160 = arith.constant dense<0.000000e+00> : vector<16x32xf32>
    %421 = tpu.matmul %418, %420, %cst_160 {dimension_numbers = #tpu.dot_dimension_numbers<[1], [0], [0], [1], [0, 0, 1, 1], [], []>} : vector<16x128xf32>, vector<128x32xf32>, vector<16x32xf32> -> vector<16x32xf32>
    %c1_161 = arith.constant 1 : index
    %c0_162 = arith.constant 0 : index
    %c0_163 = arith.constant 0 : index
    %422 = vector.load %arg16[%c1_161, %c0_162, %c0_163] : memref<2x1x32xf32, #tpu.memory_space<vmem>>, vector<1x1x32xf32>
    %423 = vector.shape_cast %422 : vector<1x1x32xf32> to vector<1x32xf32>
    %424 = vector.broadcast %423 : vector<1x32xf32> to vector<16x32xf32>
    %425 = arith.addf %421, %424 : vector<16x32xf32>
    %426 = arith.addf %398, %425 : vector<16x32xf32>
    %c1_164 = arith.constant 1 : index
    %c0_165 = arith.constant 0 : index
    %c0_166 = arith.constant 0 : index
    %427 = vector.load %arg17[%c1_164, %c0_165, %c0_166] : memref<2x1x32xf32, #tpu.memory_space<vmem>>, vector<1x1x32xf32>
    %428 = vector.shape_cast %427 : vector<1x1x32xf32> to vector<1x32xf32>
    %c1_167 = arith.constant 1 : index
    %c0_168 = arith.constant 0 : index
    %c0_169 = arith.constant 0 : index
    %429 = vector.load %arg18[%c1_167, %c0_168, %c0_169] : memref<2x1x32xf32, #tpu.memory_space<vmem>>, vector<1x1x32xf32>
    %430 = vector.shape_cast %429 : vector<1x1x32xf32> to vector<1x32xf32>
    %cst_170 = arith.constant dense<0.000000e+00> : vector<16xf32>
    %431 = vector.multi_reduction <add>, %426, %cst_170 [1] : vector<16x32xf32> to vector<16xf32>
    %432 = vector.shape_cast %431 : vector<16xf32> to vector<16x1xf32>
    %cst_171 = arith.constant 3.200000e+01 : f32
    %433 = vector.broadcast %cst_171 : f32 to vector<16x1xf32>
    %434 = arith.divf %432, %433 : vector<16x1xf32>
    %435 = vector.broadcast %434 : vector<16x1xf32> to vector<16x32xf32>
    %436 = arith.subf %426, %435 : vector<16x32xf32>
    %437 = arith.mulf %436, %436 : vector<16x32xf32>
    %cst_172 = arith.constant dense<0.000000e+00> : vector<16xf32>
    %438 = vector.multi_reduction <add>, %437, %cst_172 [1] : vector<16x32xf32> to vector<16xf32>
    %439 = vector.shape_cast %438 : vector<16xf32> to vector<16x1xf32>
    %cst_173 = arith.constant 3.200000e+01 : f32
    %440 = vector.broadcast %cst_173 : f32 to vector<16x1xf32>
    %441 = arith.divf %439, %440 : vector<16x1xf32>
    %442 = vector.broadcast %434 : vector<16x1xf32> to vector<16x32xf32>
    %443 = arith.subf %426, %442 : vector<16x32xf32>
    %cst_174 = arith.constant 9.99999996E-13 : f32
    %444 = vector.broadcast %cst_174 : f32 to vector<16x1xf32>
    %445 = arith.addf %441, %444 : vector<16x1xf32>
    %446 = math.rsqrt %445 : vector<16x1xf32>
    %447 = vector.broadcast %446 : vector<16x1xf32> to vector<16x32xf32>
    %448 = arith.mulf %443, %447 : vector<16x32xf32>
    %449 = vector.broadcast %428 : vector<1x32xf32> to vector<16x32xf32>
    %450 = arith.mulf %448, %449 : vector<16x32xf32>
    %451 = vector.broadcast %430 : vector<1x32xf32> to vector<16x32xf32>
    %452 = arith.addf %450, %451 : vector<16x32xf32>
    %453 = vector.shape_cast %452 : vector<16x32xf32> to vector<2x8x32xf32>
    %454 = vector.extract_strided_slice %453 {offsets = [0, 0, 0], sizes = [2, 1, 32], strides = [1, 1, 1]} : vector<2x8x32xf32> to vector<2x1x32xf32>
    %455 = vector.shape_cast %454 : vector<2x1x32xf32> to vector<2x32xf32>
    %456 = vector.extract_strided_slice %41 {offsets = [0, 0], sizes = [2, 1], strides = [1, 1]} : vector<2x8xf32> to vector<2x1xf32>
    %457 = vector.broadcast %456 : vector<2x1xf32> to vector<2x32xf32>
    %458 = arith.mulf %455, %457 : vector<2x32xf32>
    %c0_175 = arith.constant 0 : index
    %c0_176 = arith.constant 0 : index
    %459 = vector.load %arg19[%c0_175, %c0_176] : memref<2x32xf32, #tpu.memory_space<vmem>>, vector<2x32xf32>
    tpu.vector_store %arg19[%c0_175, %c0_176], %458 {strides = array<i32>} : memref<2x32xf32, #tpu.memory_space<vmem>>, vector<2x32xf32>,
    return
  }
  func.func @transform_0(%arg0: i32) -> (i32, i32) {
    %c0_i32 = arith.constant 0 : i32
    %c0_i32_0 = arith.constant 0 : i32
    %c0_i32_1 = arith.constant 0 : i32
    return %c0_i32, %c0_i32_0 : i32, i32
  }
  func.func @transform_1(%arg0: i32) -> (i32, i32) {
    %c0_i32 = arith.constant 0 : i32
    %c0_i32_0 = arith.constant 0 : i32
    %c0_i32_1 = arith.constant 0 : i32
    return %c0_i32, %c0_i32_0 : i32, i32
  }
  func.func @transform_2(%arg0: i32) -> (i32, i32) {
    %c0_i32 = arith.constant 0 : i32
    %c0_i32_0 = arith.constant 0 : i32
    %c0_i32_1 = arith.constant 0 : i32
    return %c0_i32, %c0_i32_0 : i32, i32
  }
  func.func @transform_3(%arg0: i32) -> (i32, i32) {
    %c0_i32 = arith.constant 0 : i32
    %c0_i32_0 = arith.constant 0 : i32
    %c0_i32_1 = arith.constant 0 : i32
    return %c0_i32, %c0_i32_0 : i32, i32
  }
  func.func @transform_4(%arg0: i32) -> (i32, i32) {
    %c0_i32 = arith.constant 0 : i32
    %c0_i32_0 = arith.constant 0 : i32
    %c0_i32_1 = arith.constant 0 : i32
    return %c0_i32, %c0_i32_0 : i32, i32
  }
  func.func @transform_5(%arg0: i32) -> (i32, i32) {
    %c0_i32 = arith.constant 0 : i32
    %c0_i32_0 = arith.constant 0 : i32
    %c0_i32_1 = arith.constant 0 : i32
    return %c0_i32, %c0_i32_0 : i32, i32
  }
  func.func @transform_6(%arg0: i32) -> (i32, i32, i32) {
    %c0_i32 = arith.constant 0 : i32
    %c0_i32_0 = arith.constant 0 : i32
    %c0_i32_1 = arith.constant 0 : i32
    %c0_i32_2 = arith.constant 0 : i32
    return %c0_i32, %c0_i32_0, %c0_i32_1 : i32, i32, i32
  }
  func.func @transform_7(%arg0: i32) -> (i32, i32, i32) {
    %c0_i32 = arith.constant 0 : i32
    %c0_i32_0 = arith.constant 0 : i32
    %c0_i32_1 = arith.constant 0 : i32
    %c0_i32_2 = arith.constant 0 : i32
    return %c0_i32, %c0_i32_0, %c0_i32_1 : i32, i32, i32
  }
  func.func @transform_8(%arg0: i32) -> (i32, i32, i32, i32) {
    %c0_i32 = arith.constant 0 : i32
    %c0_i32_0 = arith.constant 0 : i32
    %c0_i32_1 = arith.constant 0 : i32
    %c0_i32_2 = arith.constant 0 : i32
    %c0_i32_3 = arith.constant 0 : i32
    return %c0_i32, %c0_i32_0, %c0_i32_1, %c0_i32_2 : i32, i32, i32, i32
  }
  func.func @transform_9(%arg0: i32) -> (i32, i32, i32) {
    %c0_i32 = arith.constant 0 : i32
    %c0_i32_0 = arith.constant 0 : i32
    %c0_i32_1 = arith.constant 0 : i32
    %c0_i32_2 = arith.constant 0 : i32
    return %c0_i32, %c0_i32_0, %c0_i32_1 : i32, i32, i32
  }
  func.func @transform_10(%arg0: i32) -> (i32, i32, i32) {
    %c0_i32 = arith.constant 0 : i32
    %c0_i32_0 = arith.constant 0 : i32
    %c0_i32_1 = arith.constant 0 : i32
    %c0_i32_2 = arith.constant 0 : i32
    return %c0_i32, %c0_i32_0, %c0_i32_1 : i32, i32, i32
  }
  func.func @transform_11(%arg0: i32) -> (i32, i32, i32) {
    %c0_i32 = arith.constant 0 : i32
    %c0_i32_0 = arith.constant 0 : i32
    %c0_i32_1 = arith.constant 0 : i32
    %c0_i32_2 = arith.constant 0 : i32
    return %c0_i32, %c0_i32_0, %c0_i32_1 : i32, i32, i32
  }
  func.func @transform_12(%arg0: i32) -> (i32, i32, i32) {
    %c0_i32 = arith.constant 0 : i32
    %c0_i32_0 = arith.constant 0 : i32
    %c0_i32_1 = arith.constant 0 : i32
    %c0_i32_2 = arith.constant 0 : i32
    return %c0_i32, %c0_i32_0, %c0_i32_1 : i32, i32, i32
  }
  func.func @transform_13(%arg0: i32) -> (i32, i32, i32) {
    %c0_i32 = arith.constant 0 : i32
    %c0_i32_0 = arith.constant 0 : i32
    %c0_i32_1 = arith.constant 0 : i32
    %c0_i32_2 = arith.constant 0 : i32
    return %c0_i32, %c0_i32_0, %c0_i32_1 : i32, i32, i32
  }
  func.func @transform_14(%arg0: i32) -> (i32, i32, i32) {
    %c0_i32 = arith.constant 0 : i32
    %c0_i32_0 = arith.constant 0 : i32
    %c0_i32_1 = arith.constant 0 : i32
    %c0_i32_2 = arith.constant 0 : i32
    return %c0_i32, %c0_i32_0, %c0_i32_1 : i32, i32, i32
  }
  func.func @transform_15(%arg0: i32) -> (i32, i32, i32) {
    %c0_i32 = arith.constant 0 : i32
    %c0_i32_0 = arith.constant 0 : i32
    %c0_i32_1 = arith.constant 0 : i32
    %c0_i32_2 = arith.constant 0 : i32
    return %c0_i32, %c0_i32_0, %c0_i32_1 : i32, i32, i32
  }
  func.func @transform_16(%arg0: i32) -> (i32, i32, i32) {
    %c0_i32 = arith.constant 0 : i32
    %c0_i32_0 = arith.constant 0 : i32
    %c0_i32_1 = arith.constant 0 : i32
    %c0_i32_2 = arith.constant 0 : i32
    return %c0_i32, %c0_i32_0, %c0_i32_1 : i32, i32, i32
  }
  func.func @transform_17(%arg0: i32) -> (i32, i32, i32) {
    %c0_i32 = arith.constant 0 : i32
    %c0_i32_0 = arith.constant 0 : i32
    %c0_i32_1 = arith.constant 0 : i32
    %c0_i32_2 = arith.constant 0 : i32
    return %c0_i32, %c0_i32_0, %c0_i32_1 : i32, i32, i32
  }
  func.func @transform_18(%arg0: i32) -> (i32, i32) {
    %c0_i32 = arith.constant 0 : i32
    %c0_i32_0 = arith.constant 0 : i32
    %c0_i32_1 = arith.constant 0 : i32
    return %c0_i32, %c0_i32_0 : i32, i32
  }
}

</mosaic_0001>

<bundles_post_ra>
// kernel: flaubert_encoder.1
= control target key start
LH: loop header
LB: loop body
LE: loop exit
PB: predicated region body
PF: predicated region fallthrough
CT: control target
= control target key end

     0   :  { %s6077_s0 = inlined_call_operand.vmem [shape: s32[2,8], index: 0, kind: input, shape index: {}]   ;;  %s6078_s1 = inlined_call_operand.vmem [shape: s32[2,8], index: 1, kind: input, shape index: {}]   ;;  %s6079_s2 = inlined_call_operand.vmem [shape: f32[64,32], index: 2, kind: input, shape index: {}]   ;;  %s6080_s3 = inlined_call_operand.vmem [shape: f32[16,32], index: 3, kind: input, shape index: {}]   ;;  %s6081_s4 = inlined_call_operand.vmem [shape: f32[1,32], index: 4, kind: input, shape index: {}]   ;;  %s6082_s5 = inlined_call_operand.vmem [shape: f32[1,32], index: 5, kind: input, shape index: {}]   ;;  %s6083_s6 = inlined_call_operand.vmem [shape: f32[2,32,96], index: 6, kind: input, shape index: {}]   ;;  %s6084_s7 = inlined_call_operand.vmem [shape: f32[2,1,96], index: 7, kind: input, shape index: {}]   ;;  %s6085_s8 = inlined_call_operand.vmem [shape: f32[2,4,8,32], index: 8, kind: input, shape index: {}]   ;;  %s6086_s9 = inlined_call_operand.vmem [shape: f32[2,1,32], index: 9, kind: input, shape index: {}]   ;;  %s6087_s10 = inlined_call_operand.vmem [shape: f32[2,1,32], index: 10, kind: input, shape index: {}]   ;;  %s6088_s11 = inlined_call_operand.vmem [shape: f32[2,1,32], index: 11, kind: input, shape index: {}]   ;;  %s6089_s12 = inlined_call_operand.vmem [shape: f32[2,32,128], index: 12, kind: input, shape index: {}]   ;;  %s6090_s13 = inlined_call_operand.vmem [shape: f32[2,1,128], index: 13, kind: input, shape index: {}]   ;;  %s6091_s14 = inlined_call_operand.vmem [shape: f32[2,128,32], index: 14, kind: input, shape index: {}]   ;;  %s6092_s15 = inlined_call_operand.vmem [shape: f32[2,1,32], index: 15, kind: input, shape index: {}]   ;;  %s6093_s16 = inlined_call_operand.vmem [shape: f32[2,1,32], index: 16, kind: input, shape index: {}]   ;;  %s6094_s17 = inlined_call_operand.vmem [shape: f32[2,1,32], index: 17, kind: input, shape index: {}]   ;;  %s6095_s18 = inlined_call_operand.hbm [shape: f32[2,32], index: 18, kind: output, shape index: {}]  }
   0x1   :  { %6103 = sst [smem:[#allocation5_spill]] %s6077_s0 }
   0x2   :  { %6104 = sst [smem:[#allocation6_spill]] %s6078_s1 }
   0x3   :  { %6105 = sst [smem:[#allocation7_spill]] %s6079_s2 }
   0x4   :  { %v61_v0 = vlaneseq  ;;  %s6106_s29 = sld [smem:[#allocation6_spill]]  ;;  %v5306_v3 = vmov 1966171168   ;;  %s6107_s19 = sld [smem:[#allocation7_spill]]  ;;  %v5307_v12 = vmov 0.0  }
   0x5   :  { %v227_v4 = vunpack.c.l.s4 %v5306_v3  ;;  %s6108_s24 = sld [smem:[#allocation5_spill]]  ;;  %4755 = vmatprep.subr.mxu0 %v5307_v12 }
   0x6   :  { %v64_v9 = vshrl.u32 %v61_v0, 7 }
   0x7   :  { %v228_v14 = vunpack.c.0.s8 %v227_v4 }
   0xa   :  { %v5420_v1 = vld [vmem:[%s6106_s29] sm:$0x3]  ;;  %v84_v6 = vld [vmem:[%s6107_s19 + $0x8] sm:$0xff]  ;;  %v85_v7 = vld [vmem:[%s6107_s19 + $0x10] sm:$0xff] }
   0xb   :  { %v223_v2 = vcvt.s32.f32 %v5420_v1  ;;  %v83_v5 = vld [vmem:[%s6107_s19] sm:$0xff]  ;;  %v86_v11 = vld [vmem:[%s6107_s19 + $0x18] sm:$0xff]  ;;  %v88_v17 = vld [vmem:[%s6107_s19 + $0x28] sm:$0xff] }
   0xc   :  { %v60_v8 = vld [vmem:[%s6108_s24] sm:$0x3]  ;;  %v5048_v10 = vpack.c.bf16 %v84_v6, %v83_v5  ;;  %v5052_v15 = vpack.c.bf16 %v86_v11, %v85_v7 }
   0xd   :  { %v4432_v13 = vadd.f32 -1.0, %v223_v2  ;;  %v87_v16 = vld [vmem:[%s6107_s19 + $0x20] sm:$0xff] }
   0xe   :  { %23 = vsyncpa [#allocation3], 0  ;;  %v65_v18 = vsub.s32 0, %v64_v9  ;;  %v72_v19 = vsub.s32 1, %v64_v9  ;;  %5049 = vmatprep.subr.bf16.mxu1 %v5048_v10  ;;  %v231_v20 = vsub.s32 %v228_v14, %v64_v9  ;;  %v5056_v22 = vpack.c.bf16 %v88_v17, %v87_v16  ;;  %v89_v24 = vld [vmem:[%s6107_s19 + $0x30] sm:$0xff]  ;;  %v90_v25 = vld [vmem:[%s6107_s19 + $0x38] sm:$0xff] }
   0xf   :  { %5051 = vmatpush3.bf16.msra.mxu1 %v5048_v10  ;;  %v5060_v29 = vpack.c.bf16 %v90_v25, %v89_v24  ;;  %v62_v35 = vand.u32 127, %v61_v0  ;;  %vm91_vm0 = vcmask 523264   ;;  %v173_v40 = vld [vmem:[%s6080_s3] sm:$0xff]  ;;  %vm178_vm3 = vcmask 261120   ;;  %v253_v58 = vld [vmem:[%s6083_s6 + $0x8] sm:$0xff]  ;;  %v254_v59 = vld [vmem:[%s6083_s6 + $0x10] sm:$0xff] }
  0x10   :  { %v66_v21 = vrot.slane %v60_v8, %v65_v18  ;;  %5053 = vmatprep.subr.bf16.mxu1 %v5052_v15  ;;  %v232_v23 = vrot.slane %v4432_v13, %v231_v20  ;;  %v73_v26 = vrot.slane %v60_v8, %v72_v19  ;;  %v252_v57 = vld [vmem:[%s6083_s6] sm:$0xff]  ;;  %v255_v61 = vld [vmem:[%s6083_s6 + $0x18] sm:$0xff]  ;;  %vm5308_vm4 = vmmov 0   ;;  %s5309_s20 = smov 64   ;;  %s5310_s21 = smov 96  }
  0x11   :  { %v5064_v60 = vpack.c.bf16 %v253_v58, %v252_v57  ;;  %v5068_v62 = vpack.c.bf16 %v255_v61, %v254_v59  ;;  %v4430_v8 = vld [vmem:[%s6081_s4] ss:$0 sm:$0xff]  ;;  %4757 = vmatprep.mubr.msk.f32.mxu0 %vm5308_vm4, %v5307_v12  ;;  %vm363_vm5 = vcmask 64512   ;;  %s5311_s19 = smov 88   ;;  %s5312_s22 = smov 120   ;;  %vm4407_vm6 = vcmask 1041409  }
  0x12   :  { %68 = vbcast.lane.b32.xlu0 %v66_v21, 256  ;;  %v233_v27 = vcombine.high %v232_v23, %v232_v23  ;;  %v240_v28 = vrot.slane %v232_v23, %v231_v20  ;;  %v4431_v10 = vld [vmem:[%s6082_s5] ss:$0 sm:$0xff]  ;;  %s5313_s3 = smov 56   ;;  %s5314_s2 = smov 80   ;;  %vm4410_vm7 = vcmask 254976  }
  0x13   :  { %5055 = vmatpush3.bf16.msra.mxu1 %v5052_v15  ;;  %s5315_s23 = smov 112   ;;  %s5316_s24 = smov 48   ;;  %v4556_v1 = vld [vmem:[%s6094_s17 + $0x1] ss:$0 sm:$0xff] }
  0x14   :  { %5057 = vmatprep.subr.bf16.mxu1 %v5056_v22  ;;  %v247_v30 = vrot.slane %v233_v27, %v231_v20  ;;  %v250_v31 = vmul.f32 1e+09, %v240_v28  ;;  %s6099_s29 = smov 104   ;;  %s6101_s30 = smov 72  }
  0x15   :  { %s6097_s4 = smov 40   ;;  %s5321_s28 = smov [#allocation2]  }
  0x16   :  { %75 = vbcast.lane.b32.xlu0 %v73_v26, 256  ;;  %v251_v32 = vmul.f32 1e+09, %v247_v30  ;;  %v5453_v33 = vrot.slane %v250_v31, %v65_v18 }
  0x17   :  { %5059 = vmatpush3.bf16.msra.mxu1 %v5056_v22 }
  0x18   :  { %5061 = vmatprep.subr.bf16.mxu1 %v5060_v29  ;;  %v5455_v34 = vrot.slane %v251_v32, %v65_v18  ;;  %v4433_v18 = vld [vmem:[%s6084_s7] ss:$0 sm:$0xff] }
  0x1b   :  { %5063 = vmatpush3.bf16.msra.mxu1 %v5060_v29 }
  0x1c   :  { %5065 = vmatprep.subr.bf16.mxu1 %v5064_v60 }
  0x84   :  { %v69_v36 = vpop.permute.xlu0 %68 }
  0x85   :  { %vm77_vm1 = vcmp.eq.s32.totalorder %v62_v35, %v69_v36 }
  0x86   :  { %v4426_v37 = vsel %vm77_vm1, 1.0, %v5307_v12 }
  0x87   :  { %4731 = vmatprep.mubr.msk.f32.mxu1 %vm91_vm0, %v4426_v37 }
  0x88   :  { %v76_v38 = vpop.permute.xlu0 %75 }
  0x89   :  { %vm78_vm2 = vcmp.eq.s32.totalorder %v62_v35, %v76_v38 }
  0x8a   :  { %v4427_v39 = vsel %vm78_vm2, 1.0, %v5307_v12 }
  0x8b   :  { %4732 = vmatmul.mubr.msk.f32.vlgmr.msra.gmra.mrb[0].mxu1 %vm91_vm0, %v4427_v39 }
  0x8c   :  { %5067 = vmatpush3.bf16.msra.mxu1 %v5064_v60 }
  0x8d   :  { %5069 = vmatprep.subr.bf16.mxu1 %v5068_v62 }
  0x90   :  { %5071 = vmatpush3.bf16.msra.mxu1 %v5068_v62 }
  0x91   :  { %4745 = vmatprep.subr.mxu1 %v5307_v12 }
 0x15e   :  { %v4733_v41 = vpop.f32.mrb[0].mxu1 }
 0x15f   :  { %v164_v42 = vpop.f32.mrb[1].mxu1  ;;  %v175_v44 = vadd.f32 %v4733_v41, %v173_v40 }
 0x160   :  { %v174_v43 = vadd.f32 %v173_v40, %v164_v42 }
 0x161   :  { %v182_v46 = vsel %vm178_vm3, %v175_v44, 0.0 }
 0x162   :  { %v179_v45 = vsel %vm178_vm3, %v174_v43, 0.0 }
 0x163   :  { %180 = vadd.xlane.f32.xlu1 %v179_v45 }
 0x167   :  { %183 = vadd.xlane.f32.xlu1 %v182_v46 }
 0x1f0   :  { %v181_v47 = vpop.xlane.xlu1 %180 }
 0x1f1   :  { %v186_v48 = vmul.f32 0.03125, %v181_v47 }
 0x1f3   :  { %v188_v49 = vsub.f32 %v174_v43, %v186_v48 }
 0x1f4   :  { %v184_v50 = vpop.xlane.xlu1 %183 }
 0x1f5   :  { %v187_v51 = vmul.f32 0.03125, %v184_v50  ;;  %v190_v52 = vmul.f32 %v188_v49, %v188_v49 }
 0x1f7   :  { %v189_v53 = vsub.f32 %v175_v44, %v187_v51  ;;  %v192_v54 = vsel %vm178_vm3, %v190_v52, 0.0 }
 0x1f8   :  { %193 = vadd.xlane.f32.xlu0 %v192_v54 }
 0x1f9   :  { %v191_v55 = vmul.f32 %v189_v53, %v189_v53 }
 0x1fb   :  { %v195_v56 = vsel %vm178_vm3, %v191_v55, 0.0 }
 0x1fc   :  { %196 = vadd.xlane.f32.xlu1 %v195_v56 }
 0x285   :  { %v194_v63 = vpop.xlane.xlu0 %193 }
 0x286   :  { %v198_v0 = vmul.f32 0.03125, %v194_v63 }
 0x288   :  { %v200_v3 = vadd.f32 1e-12, %v198_v0 }
 0x289   :  { %v197_v4 = vpop.xlane.xlu1 %196 }
 0x28a   :  { %5190 = vrsqrt.f32 %v200_v3  ;;  %v199_v5 = vmul.f32 0.03125, %v197_v4 }
 0x28c   :  { %v201_v6 = vadd.f32 1e-12, %v199_v5 }
 0x28e   :  { %5192 = vrsqrt.f32 %v201_v6 }
 0x294   :  { %v5191_v7 = vpop.eup %5190 }
 0x295   :  { %v204_v9 = vmul.f32 %v5191_v7, %v188_v49 }
 0x297   :  { %v212_v11 = vmul.f32 %v4430_v8, %v204_v9 }
 0x298   :  { %v5193_v13 = vpop.eup %5192 }
 0x299   :  { %v205_v14 = vmul.f32 %v5193_v13, %v189_v53  ;;  %v5485_v15 = vadd.f32 %v4431_v10, %v212_v11 }
 0x29b   :  { %v213_v16 = vmul.f32 %v4430_v8, %v205_v14  ;;  %4742 = vmatprep.mubr.msk.f32.mxu1 %vm178_vm3, %v5485_v15 }
 0x29d   :  { %v5489_v17 = vadd.f32 %v4431_v10, %v213_v16 }
 0x29f   :  { %4743 = vmatmul.mubr.msk.f32.vlgmr.msra.gmra.mrb[2].mxu1 %vm178_vm3, %v5489_v17 }
 0x2a0   :  { %4747 = vmatprep.mubr.msk.f32.mxu1 %vm5308_vm4, %v5307_v12 }
 0x372   :  { %v4744_v19 = vpop.f32.mrb[2].mxu1 }
 0x373   :  { %v5500_v20 = vadd.f32 %v4744_v19, %v4433_v18  ;;  %v339_v21 = vpop.f32.mrb[3].mxu1 }
 0x374   :  { %v5502_v22 = vadd.f32 %v4433_v18, %v339_v21 }
 0x375   :  { %615 = vrot.lane.b32.xlu0 %v5500_v20, %s5309_s20 }
 0x376   :  { %361 = vrot.lane.b32.xlu1 %v5502_v22, %s5310_s21 }
 0x37a   :  { %439 = vrot.lane.b32.xlu1 %v5500_v20, %s5310_s21 }
 0x3e7   :  { %v616_v25 = vpop.permute.xlu0 %615 }
 0x3e8   :  { %v362_v23 = vpop.permute.xlu1 %361 }
 0x3e9   :  { %4746 = vmatpush3.xpose.msk.msra.mxu1 %vm363_vm5, %v362_v23 }
 0x3ea   :  { %4750 = vmatprep.subr.mxu1 %v5307_v12 }
 0x3ec   :  { %4748 = vmatmul.mubr.msk.f32.vlgmr.msra.gmra.mrb[4].mxu1 %vm363_vm5, %v5502_v22  ;;  %v440_v24 = vpop.permute.xlu1 %439 }
 0x3ed   :  { %4751 = vmatpush3.xpose.msk.msra.mxu1 %vm363_vm5, %v440_v24  ;;  %4752 = vmatprep.mubr.msk.f32.mxu1 %vm5308_vm4, %v5307_v12 }
 0x3ee   :  { %4760 = vmatprep.subr.mxu1 %v5307_v12 }
 0x3f0   :  { %4753 = vmatmul.mubr.msk.f32.vlgmr.msra.gmra.mrb[6].mxu1 %vm363_vm5, %v5500_v20 }
 0x3f1   :  { %4761 = vmatpush3.msra.mxu1 %v616_v25  ;;  %4762 = vmatprep.mubr.msk.f32.mxu1 %vm5308_vm4, %v5307_v12 }
 0x3f2   :  { %4770 = vmatprep.subr.mxu1 %v5307_v12 }
 0x4bf   :  { %v434_v26 = vpop.f32.mrb[4].mxu1 }
 0x4c0   :  { %v4749_v27 = vpop.f32.mrb[5].mxu1  ;;  %v435_v31 = vadd.f32 %v434_v26, %v5453_v33 }
 0x4c2   :  { %v515_v35 = vsel %vm363_vm5, %v435_v31, -inf }
 0x4c3   :  { %v511_v28 = vpop.f32.mrb[6].mxu1 }
 0x4c4   :  { %v512_v29 = vadd.f32 %v511_v28, %v5455_v34  ;;  %v4754_v30 = vpop.f32.mrb[7].mxu1 }
 0x4c6   :  { %v518_v32 = vsel %vm363_vm5, %v512_v29, -inf }
 0x4c7   :  { %519 = vmax.xlane.f32.xlu1 %v518_v32 }
 0x4cb   :  { %516 = vmax.xlane.f32.xlu1 %v515_v35 }
 0x4dc   :  { %539 = vrot.lane.b32.xlu1 %v5502_v22, %s5309_s20 }
 0x4e0   :  { %693 = vrot.lane.b32.xlu1 %v5502_v22, %s5311_s19 }
 0x4e4   :  { %691 = vrot.lane.b32.xlu1 %v5502_v22, %s5312_s22 }
 0x554   :  { %v520_v36 = vpop.xlane.xlu1 %519 }
 0x555   :  { %v522_v37 = vsub.f32 %v512_v29, %v520_v36 }
 0x557   :  { %v525_v38 = vmul.f32 1.442695, %v522_v37 }
 0x558   :  { %v517_v39 = vpop.xlane.xlu1 %516 }
 0x559   :  { %5194 = vpow2.f32 %v525_v38  ;;  %v521_v43 = vsub.f32 %v435_v31, %v517_v39 }
 0x55b   :  { %v523_v44 = vmul.f32 1.442695, %v521_v43 }
 0x55c   :  { %v540_v40 = vpop.permute.xlu1 %539 }
 0x55d   :  { %4756 = vmatpush3.msra.mxu0 %v540_v40  ;;  %5196 = vpow2.f32 %v523_v44 }
 0x55e   :  { %4765 = vmatprep.subr.mxu0 %v5307_v12 }
 0x560   :  { %v694_v57 = vpop.permute.xlu1 %693 }
 0x563   :  { %v5195_v41 = vpop.eup %5194 }
 0x564   :  { %v530_v42 = vsel %vm363_vm5, %v5195_v41, 0.0  ;;  %v692_v59 = vpop.permute.xlu1 %691 }
 0x565   :  { %531 = vadd.xlane.f32.xlu0 %v530_v42 }
 0x567   :  { %v5197_v45 = vpop.eup %5196 }
 0x568   :  { %v527_v46 = vsel %vm363_vm5, %v5197_v45, 0.0 }
 0x57b   :  { %771 = vrot.lane.b32.xlu0 %v5500_v20, %s5311_s19 }
 0x57f   :  { %769 = vrot.lane.b32.xlu0 %v5500_v20, %s5312_s22 }
 0x59e   :  { %528 = vadd.xlane.f32.xlu0 %v527_v46 }
 0x5b4   :  { %947 = vrot.lane.b32.xlu0 %v5500_v20, %s5313_s3 }
 0x5f2   :  { %v532_v47 = vpop.xlane.xlu0 %531 }
 0x5f3   :  { %v534_v48 = vmax.f32 %v532_v47, 1e-30 }
 0x5f5   :  { %5198 = vrcp.f32 %v534_v48 }
 0x5f6   :  { %v772_v50 = vpop.permute.xlu0 %771 }
 0x5fa   :  { %v770_v52 = vpop.permute.xlu0 %769 }
 0x5ff   :  { %v5199_v49 = vpop.eup %5198 }
 0x600   :  { %v538_v51 = vmul.f32 %v5199_v49, %v5195_v41 }
 0x602   :  { %4763 = vmatmul.mubr.msk.f32.vlgmr.msra.gmra.mrb[8].mxu1 %vm363_vm5, %v538_v51  ;;  %v257_v51 = vld [vmem:[%s6085_s8] sm:$0xff] }
 0x603   :  { %4771 = vmatpush3.xpose.msk.msra.mxu1 %vm363_vm5, %v772_v50  ;;  %4772 = vmatprep.mubr.msk.f32.mxu1 %vm5308_vm4, %v5307_v12  ;;  %v258_v50 = vld [vmem:[%s6085_s8 + $0x8] sm:$0xff] }
 0x604   :  { %4780 = vmatprep.subr.mxu1 %v5307_v12 }
 0x606   :  { %4773 = vmatmul.mubr.msk.f32.vlgmr.msra.gmra.mrb[10].mxu1 %vm363_vm5, %v770_v52 }
 0x607   :  { %4782 = vmatprep.mubr.msk.f32.mxu1 %vm5308_vm4, %v5307_v12 }
 0x62b   :  { %v529_v53 = vpop.xlane.xlu0 %528 }
 0x62c   :  { %v533_v54 = vmax.f32 %v529_v53, 1e-30 }
 0x62e   :  { %5200 = vrcp.f32 %v533_v54 }
 0x62f   :  { %v948_v55 = vpop.permute.xlu0 %947 }
 0x630   :  { %4781 = vmatpush3.msra.mxu1 %v948_v55 }
 0x631   :  { %4795 = vmatprep.subr.mxu1 %v5307_v12 }
 0x638   :  { %v5201_v56 = vpop.eup %5200 }
 0x639   :  { %v537_v58 = vmul.f32 %v5201_v56, %v5197_v45 }
 0x63b   :  { %4758 = vmatmul.mubr.msk.f32.vlgmr.msra.gmra.mrb[0].mxu0 %vm363_vm5, %v537_v58 }
 0x63c   :  { %4766 = vmatpush3.xpose.msk.msra.mxu0 %vm363_vm5, %v694_v57  ;;  %4767 = vmatprep.mubr.msk.f32.mxu0 %vm5308_vm4, %v5307_v12 }
 0x63d   :  { %4775 = vmatprep.subr.mxu0 %v5307_v12 }
 0x63f   :  { %4768 = vmatmul.mubr.msk.f32.vlgmr.msra.gmra.mrb[2].mxu0 %vm363_vm5, %v692_v59 }
 0x640   :  { %4777 = vmatprep.mubr.msk.f32.mxu0 %vm5308_vm4, %v5307_v12 }
 0x6d5   :  { %v5559_v60 = vpop.f32.mrb[8].mxu1 }
 0x6d6   :  { %v4764_v61 = vpop.f32.mrb[9].mxu1 }
 0x6d9   :  { %v843_v62 = vpop.f32.mrb[10].mxu1 }
 0x6da   :  { %v844_v63 = vadd.f32 %v843_v62, %v5455_v34  ;;  %v4774_v0 = vpop.f32.mrb[11].mxu1 }
 0x6dc   :  { %v850_v3 = vsel %vm363_vm5, %v844_v63, -inf }
 0x6dd   :  { %851 = vmax.xlane.f32.xlu1 %v850_v3  ;;  %v259_v3 = vld [vmem:[%s6085_s8 + $0x10] sm:$0xff] }
 0x6ee   :  { %1265 = vrot.lane.b32.xlu1 %v5500_v20, %s5314_s2 }
 0x70e   :  { %v5565_v4 = vpop.f32.mrb[0].mxu0 }
 0x70f   :  { %v4759_v5 = vpop.f32.mrb[1].mxu0 }
 0x712   :  { %v765_v6 = vpop.f32.mrb[2].mxu0 }
 0x713   :  { %v4769_v7 = vpop.f32.mrb[3].mxu0  ;;  %v766_v14 = vadd.f32 %v765_v6, %v5453_v33 }
 0x715   :  { %v847_v16 = vsel %vm363_vm5, %v766_v14, -inf }
 0x76a   :  { %v852_v8 = vpop.xlane.xlu1 %851 }
 0x76b   :  { %v854_v9 = vsub.f32 %v844_v63, %v852_v8 }
 0x76d   :  { %v857_v10 = vmul.f32 1.442695, %v854_v9 }
 0x76e   :  { %v1266_v26 = vpop.permute.xlu1 %1265 }
 0x76f   :  { %5202 = vpow2.f32 %v857_v10 }
 0x779   :  { %v5203_v11 = vpop.eup %5202 }
 0x77a   :  { %v862_v13 = vsel %vm363_vm5, %v5203_v11, 0.0 }
 0x77b   :  { %863 = vadd.xlane.f32.xlu0 %v862_v13 }
 0x791   :  { %1187 = vrot.lane.b32.xlu0 %v5502_v22, %s5314_s2 }
 0x795   :  { %1185 = vrot.lane.b32.xlu0 %v5502_v22, %s5315_s23 }
 0x799   :  { %1263 = vrot.lane.b32.xlu0 %v5500_v20, %s5315_s23 }
 0x7b8   :  { %848 = vmax.xlane.f32.xlu0 %v847_v16 }
 0x7ce   :  { %871 = vrot.lane.b32.xlu0 %v5502_v22, %s5313_s3 }
 0x808   :  { %v864_v18 = vpop.xlane.xlu0 %863 }
 0x809   :  { %v866_v19 = vmax.f32 %v864_v18, 1e-30 }
 0x80b   :  { %5204 = vrcp.f32 %v866_v19 }
 0x80c   :  { %v1188_v21 = vpop.permute.xlu0 %1187 }
 0x810   :  { %v1186_v25 = vpop.permute.xlu0 %1185 }
 0x814   :  { %v1264_v27 = vpop.permute.xlu0 %1263 }
 0x815   :  { %v5205_v23 = vpop.eup %5204 }
 0x816   :  { %v870_v24 = vmul.f32 %v5205_v23, %v5203_v11 }
 0x818   :  { %4783 = vmatmul.mubr.msk.f32.vlgmr.msra.gmra.mrb[12].mxu1 %vm363_vm5, %v870_v24 }
 0x819   :  { %4796 = vmatpush3.xpose.msk.msra.mxu1 %vm363_vm5, %v1188_v21  ;;  %4797 = vmatprep.mubr.msk.f32.mxu1 %vm5308_vm4, %v5307_v12 }
 0x81a   :  { %4800 = vmatprep.subr.mxu1 %v5307_v12 }
 0x81c   :  { %4798 = vmatmul.mubr.msk.f32.vlgmr.msra.gmra.mrb[14].mxu1 %vm363_vm5, %v1186_v25 }
 0x81d   :  { %4801 = vmatpush3.xpose.msk.msra.mxu1 %vm363_vm5, %v1266_v26  ;;  %4802 = vmatprep.mubr.msk.f32.mxu1 %vm5308_vm4, %v5307_v12 }
 0x81e   :  { %4810 = vmatprep.subr.mxu1 %v5307_v12 }
 0x820   :  { %4803 = vmatmul.mubr.msk.f32.vlgmr.msra.gmra.mrb[16].mxu1 %vm363_vm5, %v1264_v27 }
 0x821   :  { %4812 = vmatprep.mubr.msk.f32.mxu1 %vm5308_vm4, %v5307_v12 }
 0x845   :  { %v849_v28 = vpop.xlane.xlu0 %848 }
 0x846   :  { %v853_v29 = vsub.f32 %v766_v14, %v849_v28 }
 0x848   :  { %v855_v30 = vmul.f32 1.442695, %v853_v29 }
 0x849   :  { %v872_v31 = vpop.permute.xlu0 %871 }
 0x84a   :  { %5206 = vpow2.f32 %v855_v30  ;;  %4776 = vmatpush3.msra.mxu0 %v872_v31 }
 0x84b   :  { %4785 = vmatprep.subr.mxu0 %v258_v50 }
 0x854   :  { %v5207_v32 = vpop.eup %5206 }
 0x855   :  { %v859_v35 = vsel %vm363_vm5, %v5207_v32, 0.0 }
 0x856   :  { %860 = vadd.xlane.f32.xlu1 %v859_v35 }
 0x8e3   :  { %v861_v36 = vpop.xlane.xlu1 %860 }
 0x8e4   :  { %v865_v37 = vmax.f32 %v861_v36, 1e-30 }
 0x8e6   :  { %5208 = vrcp.f32 %v865_v37 }
 0x8eb   :  { %v1019_v38 = vpop.f32.mrb[12].mxu1 }
 0x8ec   :  { %v4784_v39 = vpop.f32.mrb[13].mxu1 }
 0x8ef   :  { %v1259_v40 = vpop.f32.mrb[14].mxu1 }
 0x8f0   :  { %v5209_v41 = vpop.eup %5208  ;;  %v1260_v42 = vadd.f32 %v1259_v40, %v5453_v33  ;;  %v4799_v43 = vpop.f32.mrb[15].mxu1 }
 0x8f1   :  { %v869_v44 = vmul.f32 %v5209_v41, %v5207_v32 }
 0x8f2   :  { %v1341_v45 = vsel %vm363_vm5, %v1260_v42, -inf }
 0x8f3   :  { %4778 = vmatmul.mubr.msk.f32.vlgmr.msra.gmra.mrb[4].mxu0 %vm363_vm5, %v869_v44  ;;  %1342 = vmax.xlane.f32.xlu1 %v1341_v45  ;;  %v1337_v46 = vpop.f32.mrb[16].mxu1 }
 0x8f4   :  { %v1338_v47 = vadd.f32 %v1337_v46, %v5455_v34  ;;  %v4804_v48 = vpop.f32.mrb[17].mxu1  ;;  %4786 = vmatpush3.msra.mxu0 %v258_v50 }
 0x8f5   :  { %4790 = vmatprep.subr.mxu0 %v257_v51 }
 0x8f6   :  { %v1344_v49 = vsel %vm363_vm5, %v1338_v47, -inf }
 0x8f7   :  { %1345 = vmax.xlane.f32.xlu1 %v1344_v49 }
 0x908   :  { %1365 = vrot.lane.b32.xlu1 %v5502_v22, %s5316_s24 }
 0x980   :  { %v1343_v52 = vpop.xlane.xlu1 %1342 }
 0x981   :  { %v1347_v53 = vsub.f32 %v1260_v42, %v1343_v52 }
 0x983   :  { %v1349_v54 = vmul.f32 1.442695, %v1347_v53 }
 0x984   :  { %v1346_v55 = vpop.xlane.xlu1 %1345 }
 0x985   :  { %5210 = vpow2.f32 %v1349_v54  ;;  %v1348_v56 = vsub.f32 %v1338_v47, %v1346_v55 }
 0x987   :  { %v1351_v57 = vmul.f32 1.442695, %v1348_v56 }
 0x988   :  { %v1366_v5 = vpop.permute.xlu1 %1365 }
 0x989   :  { %5212 = vpow2.f32 %v1351_v57 }
 0x98f   :  { %v5211_v58 = vpop.eup %5210 }
 0x990   :  { %v1353_v59 = vsel %vm363_vm5, %v5211_v58, 0.0 }
 0x991   :  { %1354 = vadd.xlane.f32.xlu0 %v1353_v59  ;;  %v4468_v59 = vld [vmem:[%s6086_s9] ss:$0 sm:$0xff] }
 0x993   :  { %v5213_v61 = vpop.eup %5212 }
 0x994   :  { %v1356_v62 = vsel %vm363_vm5, %v5213_v61, 0.0 }
 0x995   :  { %1357 = vadd.xlane.f32.xlu1 %v1356_v62 }
 0x9a6   :  { %1441 = vrot.lane.b32.xlu1 %v5500_v20, %s5316_s24 }
 0x9a7   :  { %1600 = vrot.lane.b32.xlu0 %v5502_v22, %s6099_s29 }
 0x9aa   :  { %1602 = vrot.lane.b32.xlu1 %v5502_v22, %s6101_s30 }
 0x9ae   :  { %1680 = vrot.lane.b32.xlu1 %v5500_v20, %s6101_s30 }
 0x9b2   :  { %1678 = vrot.lane.b32.xlu1 %v5500_v20, %s6099_s29 }
 0x9c6   :  { %v943_v63 = vpop.f32.mrb[4].mxu0 }
 0x9c7   :  { %v4779_v0 = vpop.f32.mrb[5].mxu0  ;;  %4787 = vmatprep.mubr.msk.f32.mxu0 %vm363_vm5, %v943_v63 }
 0x9c8   :  { %4788 = vmatmul.mubr.msk.f32.vlgmr.msra.gmra.mrb[6].mxu0 %vm363_vm5, %v1019_v38 }
 0x9c9   :  { %4792 = vmatprep.mubr.msk.f32.mxu0 %vm363_vm5, %v5565_v4  ;;  %4791 = vmatpush3.msra.mxu0 %v257_v51 }
 0x9ca   :  { %4805 = vmatprep.subr.mxu0 %v5307_v12 }
 0x9d0   :  { %4793 = vmatmul.mubr.msk.f32.vlgmr.msra.gmra.mrb[6].mxu0 %vm363_vm5, %v5559_v60 }
 0x9d1   :  { %4806 = vmatpush3.msra.mxu0 %v1366_v5  ;;  %4807 = vmatprep.mubr.msk.f32.mxu0 %vm5308_vm4, %v5307_v12 }
 0x9d2   :  { %4815 = vmatprep.subr.mxu0 %v259_v3 }
 0xa1e   :  { %v1355_v6 = vpop.xlane.xlu0 %1354 }
 0xa1f   :  { %v1359_v7 = vmax.f32 %v1355_v6, 1e-30 }
 0xa21   :  { %5214 = vrcp.f32 %v1359_v7 }
 0xa22   :  { %v1358_v4 = vpop.xlane.xlu1 %1357  ;;  %v1601_v16 = vpop.permute.xlu0 %1600 }
 0xa23   :  { %v1360_v8 = vmax.f32 %v1358_v4, 1e-30 }
 0xa25   :  { %5216 = vrcp.f32 %v1360_v8 }
 0xa26   :  { %v1442_v9 = vpop.permute.xlu1 %1441 }
 0xa27   :  { %4811 = vmatpush3.msra.mxu1 %v1442_v9 }
 0xa28   :  { %4820 = vmatprep.subr.mxu1 %v5307_v12 }
 0xa2a   :  { %v1603_v14 = vpop.permute.xlu1 %1602 }
 0xa2b   :  { %v5215_v10 = vpop.eup %5214 }
 0xa2c   :  { %v1363_v11 = vmul.f32 %v5215_v10, %v5211_v58 }
 0xa2e   :  { %4808 = vmatmul.mubr.msk.f32.vlgmr.msra.gmra.mrb[8].mxu0 %vm363_vm5, %v1363_v11  ;;  %v1681_v21 = vpop.permute.xlu1 %1680 }
 0xa2f   :  { %v5217_v60 = vpop.eup %5216  ;;  %4816 = vmatpush3.msra.mxu0 %v259_v3 }
 0xa30   :  { %v1364_v13 = vmul.f32 %v5217_v60, %v5213_v61  ;;  %4825 = vmatprep.subr.mxu0 %v5307_v12 }
 0xa32   :  { %4813 = vmatmul.mubr.msk.f32.vlgmr.msra.gmra.mrb[18].mxu1 %vm363_vm5, %v1364_v13  ;;  %v1679_v25 = vpop.permute.xlu1 %1678 }
 0xa33   :  { %4821 = vmatpush3.xpose.msk.msra.mxu1 %vm363_vm5, %v1603_v14  ;;  %4822 = vmatprep.mubr.msk.f32.mxu1 %vm5308_vm4, %v5307_v12 }
 0xa34   :  { %4830 = vmatprep.subr.mxu1 %v5307_v12 }
 0xa36   :  { %4823 = vmatmul.mubr.msk.f32.vlgmr.msra.gmra.mrb[20].mxu1 %vm363_vm5, %v1601_v16 }
 0xa37   :  { %4832 = vmatprep.mubr.msk.f32.mxu1 %vm5308_vm4, %v5307_v12 }
 0xb01   :  { %v1437_v18 = vpop.f32.mrb[8].mxu0 }
 0xb02   :  { %v4809_v19 = vpop.f32.mrb[9].mxu0  ;;  %4817 = vmatprep.mubr.msk.f32.mxu0 %vm363_vm5, %v1437_v18  ;;  %v2071_v18 = vld [vmem:[%s6089_s12 + $0x8] sm:$0xff] }
 0xb05   :  { %v1513_v23 = vpop.f32.mrb[18].mxu1 }
 0xb06   :  { %v4814_v24 = vpop.f32.mrb[19].mxu1  ;;  %4818 = vmatmul.mubr.msk.f32.vlgmr.msra.gmra.mrb[6].mxu0 %vm363_vm5, %v1513_v23  ;;  %v2073_v23 = vld [vmem:[%s6089_s12 + $0x18] sm:$0xff] }
 0xb07   :  { %4826 = vmatpush3.xpose.msk.msra.mxu0 %vm363_vm5, %v1681_v21  ;;  %4827 = vmatprep.mubr.msk.f32.mxu0 %vm5308_vm4, %v5307_v12  ;;  %v2072_v21 = vld [vmem:[%s6089_s12 + $0x10] sm:$0xff] }
 0xb08   :  { %4835 = vmatprep.subr.mxu0 %v5307_v12  ;;  %v5076_v24 = vpack.c.bf16 %v2073_v23, %v2072_v21 }
 0xb09   :  { %v1674_v26 = vpop.f32.mrb[20].mxu1 }
 0xb0a   :  { %v1675_v27 = vadd.f32 %v1674_v26, %v5453_v33  ;;  %v4824_v28 = vpop.f32.mrb[21].mxu1  ;;  %4828 = vmatmul.mubr.msk.f32.vlgmr.msra.gmra.mrb[10].mxu0 %vm363_vm5, %v1679_v25 }
 0xb0b   :  { %4837 = vmatprep.mubr.msk.f32.mxu0 %vm5308_vm4, %v5307_v12 }
 0xb0c   :  { %v1756_v29 = vsel %vm363_vm5, %v1675_v27, -inf }
 0xb0d   :  { %1757 = vmax.xlane.f32.xlu1 %v1756_v29 }
 0xb9a   :  { %v1758_v30 = vpop.xlane.xlu1 %1757 }
 0xb9b   :  { %v1762_v31 = vsub.f32 %v1675_v27, %v1758_v30 }
 0xb9d   :  { %v1764_v32 = vmul.f32 1.442695, %v1762_v31 }
 0xb9f   :  { %5218 = vpow2.f32 %v1764_v32  ;;  %v4469_v32 = vld [vmem:[%s6087_s10] ss:$0 sm:$0xff] }
 0xba9   :  { %v5219_v35 = vpop.eup %5218 }
 0xbaa   :  { %v1768_v36 = vsel %vm363_vm5, %v5219_v35, 0.0 }
 0xbab   :  { %1769 = vadd.xlane.f32.xlu1 %v1768_v36 }
 0xbdd   :  { %v1752_v37 = vpop.f32.mrb[10].mxu0 }
 0xbde   :  { %v1753_v38 = vadd.f32 %v1752_v37, %v5455_v34  ;;  %v4829_v39 = vpop.f32.mrb[11].mxu0 }
 0xbe0   :  { %v1759_v40 = vsel %vm363_vm5, %v1753_v38, -inf }
 0xbe1   :  { %1760 = vmax.xlane.f32.xlu0 %v1759_v40 }
 0xbf7   :  { %1856 = vrot.lane.b32.xlu0 %v5500_v20, %s6097_s4 }
 0xc38   :  { %v1770_v47 = vpop.xlane.xlu1 %1769 }
 0xc39   :  { %v1774_v48 = vmax.f32 %v1770_v47, 1e-30  ;;  %v2183_v47 = vld [vmem:[%s6091_s14 + $0x18] sm:$0xff] }
 0xc6e   :  { %v1761_v41 = vpop.xlane.xlu0 %1760 }
 0xc6f   :  { %v1763_v42 = vsub.f32 %v1753_v38, %v1761_v41  ;;  %v4470_v38 = vld [vmem:[%s6088_s11] ss:$0 sm:$0xff] }
 0xc71   :  { %v1766_v43 = vmul.f32 1.442695, %v1763_v42 }
 0xc72   :  { %v1857_v44 = vpop.permute.xlu0 %1856 }
 0xc73   :  { %5220 = vpow2.f32 %v1766_v43  ;;  %4836 = vmatpush3.msra.mxu0 %v1857_v44  ;;  %v2180_v43 = vld [vmem:[%s6091_s14] sm:$0xff]  ;;  %v2181_v44 = vld [vmem:[%s6091_s14 + $0x8] sm:$0xff] }
 0xc74   :  { %5222 = vrcp.f32 %v1774_v48 }
 0xc7d   :  { %v5221_v45 = vpop.eup %5220 }
 0xc7e   :  { %v1771_v46 = vsel %vm363_vm5, %v5221_v45, 0.0  ;;  %v5223_v50 = vpop.eup %5222 }
 0xc7f   :  { %1772 = vadd.xlane.f32.xlu1 %v1771_v46  ;;  %v1778_v52 = vmul.f32 %v5223_v50, %v5219_v35  ;;  %v2182_v46 = vld [vmem:[%s6091_s14 + $0x10] sm:$0xff]  ;;  %v2185_v50 = vld [vmem:[%s6091_s14 + $0x28] sm:$0xff] }
 0xc80   :  { %v5084_v48 = vpack.c.bf16 %v2183_v47, %v2182_v46 }
 0xc90   :  { %1780 = vrot.lane.b32.xlu1 %v5502_v22, %s6097_s4  ;;  %v260_v22 = vld [vmem:[%s6085_s8 + $0x18] sm:$0xff] }
 0xc91   :  { %4840 = vmatprep.subr.mxu0 %v260_v22 }
 0xd0c   :  { %v1773_v49 = vpop.xlane.xlu1 %1772 }
 0xd0d   :  { %v1775_v51 = vmax.f32 %v1773_v49, 1e-30  ;;  %v2184_v49 = vld [vmem:[%s6091_s14 + $0x20] sm:$0xff] }
 0xd0f   :  { %5224 = vrcp.f32 %v1775_v51  ;;  %v5088_v51 = vpack.c.bf16 %v2185_v50, %v2184_v49 }
 0xd10   :  { %v1781_v20 = vpop.permute.xlu1 %1780 }
 0xd11   :  { %4831 = vmatpush3.msra.mxu1 %v1781_v20  ;;  %v2186_v20 = vld [vmem:[%s6091_s14 + $0x30] sm:$0xff] }
 0xd12   :  { %4833 = vmatmul.mubr.msk.f32.vlgmr.msra.gmra.mrb[22].mxu1 %vm363_vm5, %v1778_v52  ;;  %v2187_v52 = vld [vmem:[%s6091_s14 + $0x38] sm:$0xff] }
 0xd19   :  { %v5225_v53 = vpop.eup %5224 }
 0xd1a   :  { %v1779_v54 = vmul.f32 %v5225_v53, %v5221_v45  ;;  %v5080_v45 = vpack.c.bf16 %v2181_v44, %v2180_v43  ;;  %v5092_v53 = vpack.c.bf16 %v2187_v52, %v2186_v20  ;;  %v4479_v52 = vld [vmem:[%s6083_s6 + $0x30] sm:$0xff] }
 0xd1c   :  { %4838 = vmatmul.mubr.msk.f32.vlgmr.msra.gmra.mrb[12].mxu0 %vm363_vm5, %v1779_v54  ;;  %v2188_v54 = vld [vmem:[%s6091_s14 + $0x40] sm:$0xff] }
 0xd1d   :  { %4841 = vmatpush3.msra.mxu0 %v260_v22  ;;  %v2189_v22 = vld [vmem:[%s6091_s14 + $0x48] sm:$0xff] }
 0xd1e   :  { %5081 = vmatprep.subr.bf16.mxu0 %v5080_v45 }
 0xde5   :  { %v1852_v55 = vpop.f32.mrb[22].mxu1 }
 0xde6   :  { %v4834_v56 = vpop.f32.mrb[23].mxu1  ;;  %4842 = vmatprep.mubr.msk.f32.mxu0 %vm363_vm5, %v1852_v55  ;;  %v2190_v55 = vld [vmem:[%s6091_s14 + $0x50] sm:$0xff] }
 0xde7   :  { %v5096_v56 = vpack.c.bf16 %v2189_v22, %v2188_v54 }
 0xdef   :  { %v1928_v57 = vpop.f32.mrb[12].mxu0 }
 0xdf0   :  { %v4839_v58 = vpop.f32.mrb[13].mxu0  ;;  %4843 = vmatmul.mubr.msk.f32.vlgmr.msra.gmra.mrb[6].mxu0 %vm363_vm5, %v1928_v57  ;;  %v2191_v57 = vld [vmem:[%s6091_s14 + $0x58] sm:$0xff] }
 0xdf1   :  { %5083 = vmatpush3.bf16.msra.mxu0 %v5080_v45  ;;  %v5100_v58 = vpack.c.bf16 %v2191_v57, %v2190_v55 }
 0xdf2   :  { %5085 = vmatprep.subr.bf16.mxu0 %v5084_v48 }
 0xdf5   :  { %5087 = vmatpush3.bf16.msra.mxu0 %v5084_v48 }
 0xdf6   :  { %5089 = vmatprep.subr.bf16.mxu0 %v5088_v51 }
 0xdf9   :  { %5091 = vmatpush3.bf16.msra.mxu0 %v5088_v51  ;;  %v4478_v51 = vld [vmem:[%s6083_s6 + $0x28] sm:$0xff] }
 0xdfa   :  { %5093 = vmatprep.subr.bf16.mxu0 %v5092_v53 }
 0xdfd   :  { %5095 = vmatpush3.bf16.msra.mxu0 %v5092_v53  ;;  %v4480_v53 = vld [vmem:[%s6083_s6 + $0x38] sm:$0xff] }
 0xdfe   :  { %5097 = vmatprep.subr.bf16.mxu0 %v5096_v56  ;;  %v5116_v54 = vpack.c.bf16 %v4480_v53, %v4479_v52 }
 0xe01   :  { %5099 = vmatpush3.bf16.msra.mxu0 %v5096_v56 }
 0xe02   :  { %5101 = vmatprep.subr.bf16.mxu0 %v5100_v58 }
 0xe05   :  { %5103 = vmatpush3.bf16.msra.mxu0 %v5100_v58 }
 0xec3   :  { %v4844_v61 = vpop.f32.mrb[6].mxu0 }
 0xec4   :  { %v2023_v62 = vadd.f32 %v4844_v61, %v4468_v59  ;;  %v2004_v63 = vpop.f32.mrb[7].mxu0  ;;  %v2193_v61 = vld [vmem:[%s6091_s14 + $0x68] sm:$0xff] }
 0xec5   :  { %v2022_v0 = vadd.f32 %v4468_v59, %v2004_v63  ;;  %v2192_v59 = vld [vmem:[%s6091_s14 + $0x60] sm:$0xff]  ;;  %v2194_v63 = vld [vmem:[%s6091_s14 + $0x70] sm:$0xff] }
 0xec6   :  { %v2025_v3 = vadd.f32 %v2023_v62, %v5489_v17  ;;  %v5104_v62 = vpack.c.bf16 %v2193_v61, %v2192_v59 }
 0xec7   :  { %v2024_v5 = vadd.f32 %v2022_v0, %v5485_v15  ;;  %v2070_v15 = vld [vmem:[%s6089_s12] sm:$0xff]  ;;  %v2195_v0 = vld [vmem:[%s6091_s14 + $0x78] sm:$0xff] }
 0xec8   :  { %v2031_v6 = vsel %vm178_vm3, %v2025_v3, 0.0  ;;  %v5072_v19 = vpack.c.bf16 %v2071_v18, %v2070_v15  ;;  %5105 = vmatprep.subr.bf16.mxu0 %v5104_v62 }
 0xec9   :  { %2032 = vadd.xlane.f32.xlu0 %v2031_v6  ;;  %v2028_v7 = vsel %vm178_vm3, %v2024_v5, 0.0  ;;  %5107 = vmatpush3.bf16.msra.mxu0 %v5104_v62  ;;  %v4475_v62 = vld [vmem:[%s6093_s16] ss:$0 sm:$0xff] }
 0xeca   :  { %2029 = vadd.xlane.f32.xlu1 %v2028_v7  ;;  %5073 = vmatprep.subr.bf16.mxu1 %v5072_v19 }
 0xecb   :  { %5075 = vmatpush3.bf16.msra.mxu1 %v5072_v19 }
 0xecc   :  { %5077 = vmatprep.subr.bf16.mxu1 %v5076_v24 }
 0xecf   :  { %5079 = vmatpush3.bf16.msra.mxu1 %v5076_v24 }
 0xf56   :  { %v2033_v4 = vpop.xlane.xlu0 %2032 }
 0xf57   :  { %v2035_v8 = vmul.f32 0.03125, %v2033_v4  ;;  %v2030_v9 = vpop.xlane.xlu1 %2029 }
 0xf58   :  { %v2034_v10 = vmul.f32 0.03125, %v2030_v9 }
 0xf59   :  { %v2037_v11 = vsub.f32 %v2025_v3, %v2035_v8  ;;  %v5108_v3 = vpack.c.bf16 %v2195_v0, %v2194_v63 }
 0xf5a   :  { %v2036_v60 = vsub.f32 %v2024_v5, %v2034_v10  ;;  %v4471_v5 = vld [vmem:[%s6090_s13] ss:$0 sm:$0xff] }
 0xf5b   :  { %v2039_v13 = vmul.f32 %v2037_v11, %v2037_v11  ;;  %5109 = vmatprep.subr.bf16.mxu0 %v5108_v3 }
 0xf5c   :  { %v2038_v14 = vmul.f32 %v2036_v60, %v2036_v60  ;;  %5111 = vmatpush3.bf16.msra.mxu0 %v5108_v3 }
 0xf5d   :  { %v2043_v16 = vsel %vm178_vm3, %v2039_v13, 0.0  ;;  %4932 = vmatprep.subr.mxu0 %v5307_v12 }
 0xf5e   :  { %2044 = vadd.xlane.f32.xlu0 %v2043_v16  ;;  %v2040_v17 = vsel %vm178_vm3, %v2038_v14, 0.0 }
 0xf5f   :  { %2041 = vadd.xlane.f32.xlu1 %v2040_v17 }
 0xfeb   :  { %v2045_v25 = vpop.xlane.xlu0 %2044 }
 0xfec   :  { %v2047_v26 = vmul.f32 0.03125, %v2045_v25  ;;  %v2042_v27 = vpop.xlane.xlu1 %2041 }
 0xfed   :  { %v2046_v28 = vmul.f32 0.03125, %v2042_v27 }
 0xfee   :  { %v2049_v29 = vadd.f32 1e-12, %v2047_v26 }
 0xfef   :  { %v2048_v30 = vadd.f32 1e-12, %v2046_v28 }
 0xff0   :  { %5226 = vrsqrt.f32 %v2049_v29  ;;  %v4474_v29 = vld [vmem:[%s6092_s15] ss:$0 sm:$0xff] }
 0xff1   :  { %5228 = vrsqrt.f32 %v2048_v30 }
 0xffa   :  { %v5227_v31 = vpop.eup %5226 }
 0xffb   :  { %v5229_v35 = vpop.eup %5228  ;;  %v2053_v36 = vmul.f32 %v5227_v31, %v2037_v11 }
 0xffc   :  { %v2052_v37 = vmul.f32 %v5229_v35, %v2036_v60 }
 0xffd   :  { %v2061_v39 = vmul.f32 %v4469_v32, %v2053_v36 }
 0xffe   :  { %v2060_v40 = vmul.f32 %v4469_v32, %v2052_v37 }
 0xfff   :  { %v5695_v42 = vadd.f32 %v4470_v38, %v2061_v39 }
0x1000   :  { %v5693_v41 = vadd.f32 %v4470_v38, %v2060_v40 }
0x1002   :  { %4853 = vmatprep.mubr.msk.f32.mxu1 %vm178_vm3, %v5693_v41 }
0x1003   :  { %4854 = vmatmul.mubr.msk.f32.vlgmr.msra.gmra.mrb[24].mxu1 %vm178_vm3, %v5695_v42 }
0x10d6   :  { %v4855_v6 = vpop.f32.mrb[24].mxu1 }
0x10d7   :  { %v2159_v7 = vadd.f32 %v4855_v6, %v4471_v5  ;;  %v2153_v4 = vpop.f32.mrb[25].mxu1 }
0x10d8   :  { %v2154_v8 = vadd.f32 %v4471_v5, %v2153_v4  ;;  %v4476_v5 = vld [vmem:[%s6094_s17] ss:$0 sm:$0xff] }
0x10d9   :  { %v2163_v9 = vmul.f32 %v2159_v7, %v2159_v7 }
0x10da   :  { %v2162_v10 = vmul.f32 %v2154_v8, %v2154_v8 }
0x10db   :  { %v2165_v11 = vmul.f32 %v2163_v9, %v2159_v7  ;;  %v4486_v9 = vld [vmem:[%s6084_s7 + $0x1] ss:$0 sm:$0xff]  ;;  %s6109_s7 = smov 72  }
0x10dc   :  { %v2164_v60 = vmul.f32 %v2162_v10, %v2154_v8 }
0x10dd   :  { %v2167_v13 = vmul.f32 0.044715, %v2165_v11 }
0x10de   :  { %v2166_v14 = vmul.f32 0.044715, %v2164_v60 }
0x10df   :  { %v2169_v16 = vadd.f32 %v2167_v13, %v2159_v7 }
0x10e0   :  { %v2168_v17 = vadd.f32 %v2166_v14, %v2154_v8 }
0x10e1   :  { %v2171_v15 = vmul.f32 0.7978846, %v2169_v16 }
0x10e2   :  { %v2170_v18 = vmul.f32 0.7978846, %v2168_v17 }
0x10e3   :  { %5230 = vtanh.f32 %v2171_v15 }
0x10e4   :  { %5232 = vtanh.f32 %v2170_v18 }
0x10ed   :  { %v5231_v19 = vpop.eup %5230 }
0x10ee   :  { %v5233_v21 = vpop.eup %5232  ;;  %v2175_v23 = vadd.f32 1.0, %v5231_v19 }
0x10ef   :  { %v2174_v24 = vadd.f32 1.0, %v5233_v21 }
0x10f0   :  { %v2177_v25 = vmul.f32 0.5, %v2175_v23 }
0x10f1   :  { %v2176_v26 = vmul.f32 0.5, %v2174_v24 }
0x10f2   :  { %v2179_v28 = vmul.f32 %v2177_v25, %v2159_v7 }
0x10f3   :  { %v2178_v27 = vmul.f32 %v2176_v26, %v2154_v8 }
0x10f5   :  { %4888 = vmatprep.mubr.f32.mxu0 %v2178_v27 }
0x10f6   :  { %4889 = vmatmul.mubr.f32.vlgmr.msra.gmra.mrb[14].mxu0 %v2179_v28 }
0x10f7   :  { %4934 = vmatprep.mubr.msk.f32.mxu0 %vm5308_vm4, %v5307_v12 }
0x11c9   :  { %v4890_v30 = vpop.f32.mrb[14].mxu0 }
0x11ca   :  { %v2275_v31 = vadd.f32 %v4890_v30, %v4474_v29  ;;  %v2269_v32 = vpop.f32.mrb[15].mxu0 }
0x11cb   :  { %v2270_v35 = vadd.f32 %v4474_v29, %v2269_v32 }
0x11cc   :  { %v2279_v36 = vadd.f32 %v2275_v31, %v5695_v42 }
0x11cd   :  { %v2278_v37 = vadd.f32 %v2270_v35, %v5693_v41  ;;  %v4477_v41 = vld [vmem:[%s6083_s6 + $0x20] sm:$0xff] }
0x11ce   :  { %v2285_v38 = vsel %vm178_vm3, %v2279_v36, 0.0  ;;  %v5112_v20 = vpack.c.bf16 %v4478_v51, %v4477_v41 }
0x11cf   :  { %2286 = vadd.xlane.f32.xlu0 %v2285_v38  ;;  %v2282_v39 = vsel %vm178_vm3, %v2278_v37, 0.0 }
0x11d0   :  { %2283 = vadd.xlane.f32.xlu1 %v2282_v39  ;;  %5113 = vmatprep.subr.bf16.mxu1 %v5112_v20 }
0x11d1   :  { %5115 = vmatpush3.bf16.msra.mxu1 %v5112_v20 }
0x11d2   :  { %5117 = vmatprep.subr.bf16.mxu1 %v5116_v54 }
0x11d5   :  { %5119 = vmatpush3.bf16.msra.mxu1 %v5116_v54 }
0x11d6   :  { %4902 = vmatprep.subr.mxu1 %v5307_v12 }
0x125c   :  { %v2287_v40 = vpop.xlane.xlu0 %2286 }
0x125d   :  { %v2289_v43 = vmul.f32 0.03125, %v2287_v40  ;;  %v2284_v44 = vpop.xlane.xlu1 %2283 }
0x125e   :  { %v2288_v45 = vmul.f32 0.03125, %v2284_v44 }
0x125f   :  { %v2291_v46 = vsub.f32 %v2279_v36, %v2289_v43 }
0x1260   :  { %v2290_v47 = vsub.f32 %v2278_v37, %v2288_v45 }
0x1261   :  { %v2293_v48 = vmul.f32 %v2291_v46, %v2291_v46 }
0x1262   :  { %v2292_v49 = vmul.f32 %v2290_v47, %v2290_v47 }
0x1263   :  { %v2297_v50 = vsel %vm178_vm3, %v2293_v48, 0.0 }
0x1264   :  { %2298 = vadd.xlane.f32.xlu0 %v2297_v50  ;;  %v2294_v42 = vsel %vm178_vm3, %v2292_v49, 0.0 }
0x1265   :  { %2295 = vadd.xlane.f32.xlu1 %v2294_v42 }
0x12f1   :  { %v2299_v22 = vpop.xlane.xlu0 %2298 }
0x12f2   :  { %v2301_v55 = vmul.f32 0.03125, %v2299_v22  ;;  %v2296_v56 = vpop.xlane.xlu1 %2295 }
0x12f3   :  { %v2300_v57 = vmul.f32 0.03125, %v2296_v56 }
0x12f4   :  { %v2303_v58 = vadd.f32 1e-12, %v2301_v55 }
0x12f5   :  { %v2302_v59 = vadd.f32 1e-12, %v2300_v57 }
0x12f6   :  { %5234 = vrsqrt.f32 %v2303_v58 }
0x12f7   :  { %5236 = vrsqrt.f32 %v2302_v59 }
0x1300   :  { %v5235_v61 = vpop.eup %5234 }
0x1301   :  { %v5237_v63 = vpop.eup %5236  ;;  %v2307_v0 = vmul.f32 %v5235_v61, %v2291_v46 }
0x1302   :  { %v2306_v3 = vmul.f32 %v5237_v63, %v2290_v47 }
0x1303   :  { %v2315_v6 = vmul.f32 %v4475_v62, %v2307_v0 }
0x1304   :  { %v2314_v7 = vmul.f32 %v4475_v62, %v2306_v3 }
0x1305   :  { %v5785_v8 = vadd.f32 %v4476_v5, %v2315_v6 }
0x1306   :  { %v5783_v4 = vadd.f32 %v4476_v5, %v2314_v7 }
0x1308   :  { %4899 = vmatprep.mubr.msk.f32.mxu1 %vm178_vm3, %v5783_v4 }
0x1309   :  { %4900 = vmatmul.mubr.msk.f32.vlgmr.msra.gmra.mrb[26].mxu1 %vm178_vm3, %v5785_v8 }
0x130a   :  { %4904 = vmatprep.mubr.msk.f32.mxu1 %vm5308_vm4, %v5307_v12 }
0x13dc   :  { %v4901_v10 = vpop.f32.mrb[26].mxu1 }
0x13dd   :  { %v5796_v11 = vadd.f32 %v4901_v10, %v4486_v9  ;;  %v2414_v60 = vpop.f32.mrb[27].mxu1 }
0x13de   :  { %v5798_v13 = vadd.f32 %v4486_v9, %v2414_v60 }
0x13df   :  { %2501 = vrot.lane.b32.xlu0 %v5796_v11, %s5310_s21 }
0x13e0   :  { %2424 = vrot.lane.b32.xlu1 %v5798_v13, %s5310_s21 }
0x1451   :  { %v2502_v16 = vpop.permute.xlu0 %2501 }
0x1452   :  { %v2425_v14 = vpop.permute.xlu1 %2424 }
0x1453   :  { %4903 = vmatpush3.xpose.msk.msra.mxu1 %vm363_vm5, %v2425_v14 }
0x1454   :  { %4907 = vmatprep.subr.mxu1 %v5307_v12 }
0x1456   :  { %4905 = vmatmul.mubr.msk.f32.vlgmr.msra.gmra.mrb[28].mxu1 %vm363_vm5, %v5798_v13 }
0x1457   :  { %4908 = vmatpush3.xpose.msk.msra.mxu1 %vm363_vm5, %v2502_v16  ;;  %4909 = vmatprep.mubr.msk.f32.mxu1 %vm5308_vm4, %v5307_v12 }
0x1458   :  { %4912 = vmatprep.subr.mxu1 %v5307_v12 }
0x145a   :  { %4910 = vmatmul.mubr.msk.f32.vlgmr.msra.gmra.mrb[30].mxu1 %vm363_vm5, %v5796_v11 }
0x145b   :  { %4914 = vmatprep.mubr.msk.f32.mxu1 %vm5308_vm4, %v5307_v12 }
0x1529   :  { %v2496_v17 = vpop.f32.mrb[28].mxu1 }
0x152a   :  { %v2497_v15 = vadd.f32 %v2496_v17, %v5453_v33  ;;  %v4906_v18 = vpop.f32.mrb[29].mxu1 }
0x152c   :  { %v2577_v19 = vsel %vm363_vm5, %v2497_v15, -inf }
0x152d   :  { %2578 = vmax.xlane.f32.xlu1 %v2577_v19  ;;  %v2573_v21 = vpop.f32.mrb[30].mxu1 }
0x152e   :  { %v2574_v23 = vadd.f32 %v2573_v21, %v5455_v34  ;;  %v4911_v24 = vpop.f32.mrb[31].mxu1 }
0x1530   :  { %v2580_v25 = vsel %vm363_vm5, %v2574_v23, -inf }
0x1531   :  { %2581 = vmax.xlane.f32.xlu0 %v2580_v25 }
0x153e   :  { %2601 = vrot.lane.b32.xlu1 %v5798_v13, %s5309_s20 }
0x15ba   :  { %v2579_v26 = vpop.xlane.xlu1 %2578 }
0x15bb   :  { %v2583_v27 = vsub.f32 %v2497_v15, %v2579_v26 }
0x15bd   :  { %v2585_v28 = vmul.f32 1.442695, %v2583_v27 }
0x15be   :  { %v2602_v29 = vpop.permute.xlu1 %2601  ;;  %v2582_v30 = vpop.xlane.xlu0 %2581 }
0x15bf   :  { %5238 = vpow2.f32 %v2585_v28  ;;  %v2584_v31 = vsub.f32 %v2574_v23, %v2582_v30  ;;  %4913 = vmatpush3.msra.mxu1 %v2602_v29 }
0x15c0   :  { %4917 = vmatprep.subr.mxu1 %v5307_v12 }
0x15c1   :  { %v2587_v32 = vmul.f32 1.442695, %v2584_v31 }
0x15c3   :  { %5240 = vpow2.f32 %v2587_v32 }
0x15c9   :  { %v5239_v35 = vpop.eup %5238 }
0x15ca   :  { %v2589_v36 = vsel %vm363_vm5, %v5239_v35, 0.0 }
0x15cb   :  { %2590 = vadd.xlane.f32.xlu1 %v2589_v36 }
0x15cd   :  { %v5241_v37 = vpop.eup %5240 }
0x15ce   :  { %v2592_v38 = vsel %vm363_vm5, %v5241_v37, 0.0 }
0x15cf   :  { %2593 = vadd.xlane.f32.xlu0 %v2592_v38 }
0x15dc   :  { %2755 = vrot.lane.b32.xlu1 %v5798_v13, %s5311_s19 }
0x15e0   :  { %2753 = vrot.lane.b32.xlu1 %v5798_v13, %s5312_s22 }
0x15e4   :  { %2831 = vrot.lane.b32.xlu1 %v5796_v11, %s5312_s22 }
0x15e5   :  { %2677 = vrot.lane.b32.xlu0 %v5796_v11, %s5309_s20  ;;  %s6110_s20 = smov 104  }
0x15e8   :  { %3249 = vrot.lane.b32.xlu1 %v5798_v13, %s5314_s2 }
0x15e9   :  { %2833 = vrot.lane.b32.xlu0 %v5796_v11, %s5311_s19 }
0x1658   :  { %v2591_v39 = vpop.xlane.xlu1 %2590 }
0x1659   :  { %v2595_v40 = vmax.f32 %v2591_v39, 1e-30 }
0x165b   :  { %5242 = vrcp.f32 %v2595_v40 }
0x165c   :  { %v2594_v43 = vpop.xlane.xlu0 %2593  ;;  %v2756_v49 = vpop.permute.xlu1 %2755 }
0x165d   :  { %v2596_v44 = vmax.f32 %v2594_v43, 1e-30 }
0x165f   :  { %5244 = vrcp.f32 %v2596_v44 }
0x1660   :  { %v2678_v47 = vpop.permute.xlu0 %2677  ;;  %v2754_v42 = vpop.permute.xlu1 %2753 }
0x1664   :  { %v2834_v41 = vpop.permute.xlu0 %2833  ;;  %v2832_v51 = vpop.permute.xlu1 %2831 }
0x1665   :  { %v5243_v45 = vpop.eup %5242 }
0x1666   :  { %v2599_v46 = vmul.f32 %v5243_v45, %v5239_v35 }
0x1668   :  { %4915 = vmatmul.mubr.msk.f32.vlgmr.msra.gmra.mrb[32].mxu1 %vm363_vm5, %v2599_v46  ;;  %v3250_v9 = vpop.permute.xlu1 %3249  ;;  %v4483_v46 = vld [vmem:[%s6085_s8 + $0x28] sm:$0xff] }
0x1669   :  { %v5245_v48 = vpop.eup %5244  ;;  %4918 = vmatpush3.msra.mxu1 %v2678_v47  ;;  %4919 = vmatprep.mubr.msk.f32.mxu1 %vm5308_vm4, %v5307_v12  ;;  %v4482_v47 = vld [vmem:[%s6085_s8 + $0x20] sm:$0xff] }
0x166a   :  { %v2600_v50 = vmul.f32 %v5245_v48, %v5241_v37  ;;  %4922 = vmatprep.subr.mxu1 %v5307_v12 }
0x166c   :  { %4920 = vmatmul.mubr.msk.f32.vlgmr.msra.gmra.mrb[34].mxu1 %vm363_vm5, %v2600_v50 }
0x166d   :  { %4924 = vmatprep.mubr.msk.f32.mxu1 %vm5308_vm4, %v5307_v12 }
0x1670   :  { %4923 = vmatpush3.xpose.msk.msra.mxu1 %vm363_vm5, %v2756_v49 }
0x1671   :  { %4927 = vmatprep.subr.mxu1 %v5307_v12 }
0x1673   :  { %4925 = vmatmul.mubr.msk.f32.vlgmr.msra.gmra.mrb[36].mxu1 %vm363_vm5, %v2754_v42 }
0x1674   :  { %4928 = vmatpush3.xpose.msk.msra.mxu1 %vm363_vm5, %v2834_v41  ;;  %4929 = vmatprep.mubr.msk.f32.mxu1 %vm5308_vm4, %v5307_v12 }
0x1675   :  { %4937 = vmatprep.subr.mxu1 %v5307_v12 }
0x1677   :  { %4930 = vmatmul.mubr.msk.f32.vlgmr.msra.gmra.mrb[38].mxu1 %vm363_vm5, %v2832_v51 }
0x1678   :  { %4939 = vmatprep.mubr.msk.f32.mxu1 %vm5308_vm4, %v5307_v12 }
0x173b   :  { %v5854_v20 = vpop.f32.mrb[32].mxu1 }
0x173c   :  { %v4916_v52 = vpop.f32.mrb[33].mxu1 }
0x173f   :  { %v5856_v53 = vpop.f32.mrb[34].mxu1 }
0x1740   :  { %v4921_v54 = vpop.f32.mrb[35].mxu1 }
0x1746   :  { %v2827_v22 = vpop.f32.mrb[36].mxu1 }
0x1747   :  { %v4926_v55 = vpop.f32.mrb[37].mxu1  ;;  %v2828_v6 = vadd.f32 %v2827_v22, %v5453_v33 }
0x1749   :  { %v2909_v7 = vsel %vm363_vm5, %v2828_v6, -inf }
0x174a   :  { %v2905_v56 = vpop.f32.mrb[38].mxu1 }
0x174b   :  { %v2906_v57 = vadd.f32 %v2905_v56, %v5455_v34  ;;  %v4931_v58 = vpop.f32.mrb[39].mxu1 }
0x174d   :  { %v2912_v59 = vsel %vm363_vm5, %v2906_v57, -inf }
0x174e   :  { %2913 = vmax.xlane.f32.xlu0 %v2912_v59 }
0x1764   :  { %3009 = vrot.lane.b32.xlu0 %v5796_v11, %s5313_s3 }
0x1768   :  { %3247 = vrot.lane.b32.xlu0 %v5798_v13, %s5315_s23 }
0x176c   :  { %3325 = vrot.lane.b32.xlu0 %v5796_v11, %s5315_s23 }
0x17db   :  { %v2914_v61 = vpop.xlane.xlu0 %2913 }
0x17dc   :  { %v2916_v62 = vsub.f32 %v2906_v57, %v2914_v61 }
0x17de   :  { %v2919_v63 = vmul.f32 1.442695, %v2916_v62 }
0x17df   :  { %v3010_v0 = vpop.permute.xlu0 %3009 }
0x17e0   :  { %5246 = vpow2.f32 %v2919_v63  ;;  %4938 = vmatpush3.msra.mxu1 %v3010_v0  ;;  %v4484_v63 = vld [vmem:[%s6085_s8 + $0x30] sm:$0xff] }
0x17e1   :  { %4952 = vmatprep.subr.mxu1 %v5307_v12 }
0x17e3   :  { %v3248_v17 = vpop.permute.xlu0 %3247 }
0x17e7   :  { %v3326_v18 = vpop.permute.xlu0 %3325 }
0x17ea   :  { %v5247_v3 = vpop.eup %5246 }
0x17eb   :  { %v2924_v5 = vsel %vm363_vm5, %v5247_v3, 0.0 }
0x17ec   :  { %2925 = vadd.xlane.f32.xlu1 %v2924_v5 }
0x17fd   :  { %3327 = vrot.lane.b32.xlu1 %v5796_v11, %s5314_s2 }
0x1821   :  { %2910 = vmax.xlane.f32.xlu1 %v2909_v7 }
0x1879   :  { %v2926_v10 = vpop.xlane.xlu1 %2925 }
0x187a   :  { %v2928_v60 = vmax.f32 %v2926_v10, 1e-30 }
0x187c   :  { %5248 = vrcp.f32 %v2928_v60 }
0x187d   :  { %v3328_v15 = vpop.permute.xlu1 %3327 }
0x1886   :  { %v5249_v14 = vpop.eup %5248 }
0x1887   :  { %v2932_v16 = vmul.f32 %v5249_v14, %v5247_v3 }
0x1889   :  { %4940 = vmatmul.mubr.msk.f32.vlgmr.msra.gmra.mrb[40].mxu1 %vm363_vm5, %v2932_v16 }
0x188a   :  { %4953 = vmatpush3.xpose.msk.msra.mxu1 %vm363_vm5, %v3250_v9  ;;  %4954 = vmatprep.mubr.msk.f32.mxu1 %vm5308_vm4, %v5307_v12 }
0x188b   :  { %4957 = vmatprep.subr.mxu1 %v5307_v12 }
0x188d   :  { %4955 = vmatmul.mubr.msk.f32.vlgmr.msra.gmra.mrb[42].mxu1 %vm363_vm5, %v3248_v17 }
0x188e   :  { %4958 = vmatpush3.xpose.msk.msra.mxu1 %vm363_vm5, %v3328_v15  ;;  %4959 = vmatprep.mubr.msk.f32.mxu1 %vm5308_vm4, %v5307_v12 }
0x188f   :  { %4967 = vmatprep.subr.mxu1 %v5307_v12 }
0x1891   :  { %4960 = vmatmul.mubr.msk.f32.vlgmr.msra.gmra.mrb[44].mxu1 %vm363_vm5, %v3326_v18 }
0x1892   :  { %4969 = vmatprep.mubr.msk.f32.mxu1 %vm5308_vm4, %v5307_v12 }
0x18ae   :  { %v2911_v19 = vpop.xlane.xlu1 %2910 }
0x18af   :  { %v2915_v21 = vsub.f32 %v2828_v6, %v2911_v19 }
0x18b1   :  { %v2917_v23 = vmul.f32 1.442695, %v2915_v21 }
0x18b3   :  { %5250 = vpow2.f32 %v2917_v23 }
0x18bd   :  { %v5251_v24 = vpop.eup %5250 }
0x18be   :  { %v2921_v25 = vsel %vm363_vm5, %v5251_v24, 0.0 }
0x18bf   :  { %2922 = vadd.xlane.f32.xlu0 %v2921_v25 }
0x18d5   :  { %2933 = vrot.lane.b32.xlu0 %v5798_v13, %s5313_s3 }
0x18d9   :  { %3503 = vrot.lane.b32.xlu0 %v5796_v11, %s5316_s24 }
0x18dd   :  { %3664 = vrot.lane.b32.xlu0 %v5798_v13, %s6109_s7 }
0x18e1   :  { %3742 = vrot.lane.b32.xlu0 %v5796_v11, %s6109_s7 }
0x18e5   :  { %3662 = vrot.lane.b32.xlu0 %v5798_v13, %s6110_s20 }
0x194c   :  { %v2923_v26 = vpop.xlane.xlu0 %2922 }
0x194d   :  { %v2927_v27 = vmax.f32 %v2923_v26, 1e-30 }
0x194f   :  { %5252 = vrcp.f32 %v2927_v27 }
0x1950   :  { %v2934_v28 = vpop.permute.xlu0 %2933 }
0x1951   :  { %4933 = vmatpush3.msra.mxu0 %v2934_v28 }
0x1952   :  { %4942 = vmatprep.subr.mxu0 %v4483_v46 }
0x1954   :  { %v3504_v29 = vpop.permute.xlu0 %3503 }
0x1955   :  { %4968 = vmatpush3.msra.mxu1 %v3504_v29 }
0x1956   :  { %4977 = vmatprep.subr.mxu1 %v5307_v12 }
0x1958   :  { %v3665_v0 = vpop.permute.xlu0 %3664 }
0x1959   :  { %v5253_v30 = vpop.eup %5252 }
0x195a   :  { %v2931_v31 = vmul.f32 %v5253_v30, %v5251_v24 }
0x195c   :  { %4935 = vmatmul.mubr.msk.f32.vlgmr.msra.gmra.mrb[16].mxu0 %vm363_vm5, %v2931_v31  ;;  %v3081_v32 = vpop.f32.mrb[40].mxu1  ;;  %v3743_v6 = vpop.permute.xlu0 %3742 }
0x195d   :  { %v4941_v35 = vpop.f32.mrb[41].mxu1  ;;  %4943 = vmatpush3.msra.mxu0 %v4483_v46 }
0x195e   :  { %4947 = vmatprep.subr.mxu0 %v4482_v47 }
0x1960   :  { %v3321_v36 = vpop.f32.mrb[42].mxu1  ;;  %v3663_v9 = vpop.permute.xlu0 %3662 }
0x1961   :  { %v3322_v37 = vadd.f32 %v3321_v36, %v5453_v33  ;;  %v4956_v38 = vpop.f32.mrb[43].mxu1 }
0x1963   :  { %v3403_v39 = vsel %vm363_vm5, %v3322_v37, -inf }
0x1964   :  { %3404 = vmax.xlane.f32.xlu1 %v3403_v39  ;;  %v3399_v40 = vpop.f32.mrb[44].mxu1 }
0x1965   :  { %v3400_v43 = vadd.f32 %v3399_v40, %v5455_v34  ;;  %v4961_v44 = vpop.f32.mrb[45].mxu1 }
0x1966   :  { %v4485_v44 = vld [vmem:[%s6085_s8 + $0x38] sm:$0xff]  ;;  %s4418_s8 = sshll.u32 %s5321_s28, 4  ;;  %s4419_s8 = int_to_ptr.vmem [resolvable:$true] %s4418_s8 }
0x1967   :  { %v3406_v45 = vsel %vm363_vm5, %v3400_v43, -inf  ;;  %p5287_p1 = scmp.lt.s32.totalorder %s4419_s8, %s4419_s8 }
0x1968   :  { %3407 = vmax.xlane.f32.xlu1 %v3406_v45 }
0x19f1   :  { %v3405_v48 = vpop.xlane.xlu1 %3404 }
0x19f2   :  { %v3409_v49 = vsub.f32 %v3322_v37, %v3405_v48 }
0x19f4   :  { %v3411_v50 = vmul.f32 1.442695, %v3409_v49 }
0x19f5   :  { %v3408_v42 = vpop.xlane.xlu1 %3407 }
0x19f6   :  { %5254 = vpow2.f32 %v3411_v50  ;;  %v3410_v41 = vsub.f32 %v3400_v43, %v3408_v42  ;;  %v4522_v42 = vld [vmem:[%s6086_s9 + $0x1] ss:$0 sm:$0xff] }
0x19f8   :  { %v3413_v51 = vmul.f32 1.442695, %v3410_v41 }
0x19fa   :  { %5256 = vpow2.f32 %v3413_v51 }
0x1a00   :  { %v5255_v52 = vpop.eup %5254 }
0x1a01   :  { %v3415_v54 = vsel %vm363_vm5, %v5255_v52, 0.0 }
0x1a02   :  { %3416 = vadd.xlane.f32.xlu1 %v3415_v54 }
0x1a04   :  { %v5257_v22 = vpop.eup %5256 }
0x1a05   :  { %v3418_v55 = vsel %vm363_vm5, %v5257_v22, 0.0 }
0x1a06   :  { %3419 = vadd.xlane.f32.xlu1 %v3418_v55 }
0x1a17   :  { %3427 = vrot.lane.b32.xlu1 %v5798_v13, %s5316_s24  ;;  %s6111_s24 = smov 40  }
0x1a1b   :  { %3740 = vrot.lane.b32.xlu1 %v5796_v11, %s6110_s20 }
0x1a2f   :  { %v3005_v56 = vpop.f32.mrb[16].mxu0 }
0x1a30   :  { %v4936_v57 = vpop.f32.mrb[17].mxu0  ;;  %4944 = vmatprep.mubr.msk.f32.mxu0 %vm363_vm5, %v3005_v56 }
0x1a31   :  { %4945 = vmatmul.mubr.msk.f32.vlgmr.msra.gmra.mrb[18].mxu0 %vm363_vm5, %v3081_v32 }
0x1a32   :  { %4949 = vmatprep.mubr.msk.f32.mxu0 %vm363_vm5, %v5854_v20  ;;  %4948 = vmatpush3.msra.mxu0 %v4482_v47 }
0x1a33   :  { %4962 = vmatprep.subr.mxu0 %v5307_v12 }
0x1a39   :  { %4950 = vmatmul.mubr.msk.f32.vlgmr.msra.gmra.mrb[18].mxu0 %vm363_vm5, %v5856_v53 }
0x1a3a   :  { %4964 = vmatprep.mubr.msk.f32.mxu0 %vm5308_vm4, %v5307_v12 }
0x1a8f   :  { %v3417_v58 = vpop.xlane.xlu1 %3416 }
0x1a90   :  { %v3421_v59 = vmax.f32 %v3417_v58, 1e-30 }
0x1a92   :  { %5258 = vrcp.f32 %v3421_v59 }
0x1a93   :  { %v3420_v61 = vpop.xlane.xlu1 %3419 }
0x1a94   :  { %v3422_v62 = vmax.f32 %v3420_v61, 1e-30 }
0x1a96   :  { %5260 = vrcp.f32 %v3422_v62 }
0x1a97   :  { %v3428_v20 = vpop.permute.xlu1 %3427 }
0x1a98   :  { %4963 = vmatpush3.msra.mxu0 %v3428_v20 }
0x1a99   :  { %4972 = vmatprep.subr.mxu0 %v4484_v63 }
0x1a9b   :  { %v3741_v17 = vpop.permute.xlu1 %3740 }
0x1a9c   :  { %v5259_v3 = vpop.eup %5258 }
0x1a9d   :  { %v3425_v5 = vmul.f32 %v5259_v3, %v5255_v52 }
0x1a9f   :  { %4965 = vmatmul.mubr.msk.f32.vlgmr.msra.gmra.mrb[20].mxu0 %vm363_vm5, %v3425_v5 }
0x1aa0   :  { %v5261_v53 = vpop.eup %5260  ;;  %4973 = vmatpush3.msra.mxu0 %v4484_v63 }
0x1aa1   :  { %v3426_v7 = vmul.f32 %v5261_v53, %v5257_v22  ;;  %4982 = vmatprep.subr.mxu0 %v5307_v12  ;;  %v4528_v53 = vld [vmem:[%s6089_s12 + $0x28] sm:$0xff] }
0x1aa3   :  { %4970 = vmatmul.mubr.msk.f32.vlgmr.msra.gmra.mrb[46].mxu1 %vm363_vm5, %v3426_v7  ;;  %v4529_v7 = vld [vmem:[%s6089_s12 + $0x30] sm:$0xff] }
0x1aa4   :  { %4978 = vmatpush3.xpose.msk.msra.mxu1 %vm363_vm5, %v3665_v0  ;;  %4979 = vmatprep.mubr.msk.f32.mxu1 %vm5308_vm4, %v5307_v12 }
0x1aa5   :  { %4987 = vmatprep.subr.mxu1 %v5307_v12 }
0x1aa7   :  { %4980 = vmatmul.mubr.msk.f32.vlgmr.msra.gmra.mrb[48].mxu1 %vm363_vm5, %v3663_v9  ;;  %v4530_v9 = vld [vmem:[%s6089_s12 + $0x38] sm:$0xff] }
0x1aa8   :  { %4989 = vmatprep.mubr.msk.f32.mxu1 %vm5308_vm4, %v5307_v12 }
0x1b72   :  { %v3499_v10 = vpop.f32.mrb[20].mxu0 }
0x1b73   :  { %v4966_v60 = vpop.f32.mrb[21].mxu0  ;;  %4974 = vmatprep.mubr.msk.f32.mxu0 %vm363_vm5, %v3499_v10  ;;  %v5124_v10 = vpack.c.bf16 %v4530_v9, %v4529_v7 }
0x1b76   :  { %v3575_v14 = vpop.f32.mrb[46].mxu1 }
0x1b77   :  { %v4971_v16 = vpop.f32.mrb[47].mxu1  ;;  %4975 = vmatmul.mubr.msk.f32.vlgmr.msra.gmra.mrb[18].mxu0 %vm363_vm5, %v3575_v14 }
0x1b78   :  { %4983 = vmatpush3.xpose.msk.msra.mxu0 %vm363_vm5, %v3743_v6  ;;  %4984 = vmatprep.mubr.msk.f32.mxu0 %vm5308_vm4, %v5307_v12 }
0x1b79   :  { %4992 = vmatprep.subr.mxu0 %v5307_v12 }
0x1b7a   :  { %v3736_v15 = vpop.f32.mrb[48].mxu1 }
0x1b7b   :  { %v3737_v18 = vadd.f32 %v3736_v15, %v5453_v33  ;;  %v4981_v19 = vpop.f32.mrb[49].mxu1  ;;  %4985 = vmatmul.mubr.msk.f32.vlgmr.msra.gmra.mrb[22].mxu0 %vm363_vm5, %v3741_v17 }
0x1b7c   :  { %4994 = vmatprep.mubr.msk.f32.mxu0 %vm5308_vm4, %v5307_v12 }
0x1b7d   :  { %v3818_v21 = vsel %vm363_vm5, %v3737_v18, -inf }
0x1b7e   :  { %3819 = vmax.xlane.f32.xlu0 %v3818_v21  ;;  %v4525_v21 = vld [vmem:[%s6087_s10 + $0x1] ss:$0 sm:$0xff] }
0x1c0b   :  { %v3820_v23 = vpop.xlane.xlu0 %3819 }
0x1c0c   :  { %v3824_v24 = vsub.f32 %v3737_v18, %v3820_v23 }
0x1c0e   :  { %v3826_v25 = vmul.f32 1.442695, %v3824_v24 }
0x1c10   :  { %5262 = vpow2.f32 %v3826_v25 }
0x1c1a   :  { %v5263_v26 = vpop.eup %5262 }
0x1c1b   :  { %v3830_v27 = vsel %vm363_vm5, %v5263_v26, 0.0 }
0x1c1c   :  { %3831 = vadd.xlane.f32.xlu0 %v3830_v27 }
0x1c4e   :  { %v3814_v28 = vpop.f32.mrb[22].mxu0 }
0x1c4f   :  { %v3815_v33 = vadd.f32 %v3814_v28, %v5455_v34  ;;  %v4986_v29 = vpop.f32.mrb[23].mxu0 }
0x1c51   :  { %v3821_v30 = vsel %vm363_vm5, %v3815_v33, -inf }
0x1c52   :  { %3822 = vmax.xlane.f32.xlu1 %v3821_v30  ;;  %v4535_v30 = vld [vmem:[%s6091_s14 + $0x80] sm:$0xff] }
0x1c63   :  { %3842 = vrot.lane.b32.xlu1 %v5798_v13, %s6111_s24 }
0x1ca9   :  { %v3832_v12 = vpop.xlane.xlu0 %3831 }
0x1caa   :  { %v3836_v31 = vmax.f32 %v3832_v12, 1e-30  ;;  %v4536_v12 = vld [vmem:[%s6091_s14 + $0x88] sm:$0xff] }
0x1cac   :  { %5264 = vrcp.f32 %v3836_v31  ;;  %v5128_v31 = vpack.c.bf16 %v4536_v12, %v4535_v30 }
0x1cb6   :  { %v5265_v35 = vpop.eup %5264 }
0x1cb7   :  { %v3840_v39 = vmul.f32 %v5265_v35, %v5263_v26  ;;  %v4526_v26 = vld [vmem:[%s6088_s11 + $0x1] ss:$0 sm:$0xff]  ;;  %v4538_v35 = vld [vmem:[%s6091_s14 + $0x98] sm:$0xff] }
0x1cdf   :  { %v3823_v32 = vpop.xlane.xlu1 %3822 }
0x1ce0   :  { %v3825_v36 = vsub.f32 %v3815_v33, %v3823_v32  ;;  %v4537_v32 = vld [vmem:[%s6091_s14 + $0x90] sm:$0xff] }
0x1ce2   :  { %v3828_v37 = vmul.f32 1.442695, %v3825_v36  ;;  %v5132_v36 = vpack.c.bf16 %v4538_v35, %v4537_v32 }
0x1ce3   :  { %v3843_v38 = vpop.permute.xlu1 %3842 }
0x1ce4   :  { %5266 = vpow2.f32 %v3828_v37  ;;  %4988 = vmatpush3.msra.mxu1 %v3843_v38  ;;  %v4539_v37 = vld [vmem:[%s6091_s14 + $0xa0] sm:$0xff]  ;;  %v4540_v38 = vld [vmem:[%s6091_s14 + $0xa8] sm:$0xff] }
0x1ce5   :  { %4990 = vmatmul.mubr.msk.f32.vlgmr.msra.gmra.mrb[50].mxu1 %vm363_vm5, %v3840_v39  ;;  %v5136_v39 = vpack.c.bf16 %v4540_v38, %v4539_v37 }
0x1cee   :  { %v5267_v34 = vpop.eup %5266 }
0x1cef   :  { %v3833_v40 = vsel %vm363_vm5, %v5267_v34, 0.0 }
0x1cf0   :  { %3834 = vadd.xlane.f32.xlu0 %v3833_v40  ;;  %v4542_v40 = vld [vmem:[%s6091_s14 + $0xb8] sm:$0xff] }
0x1d06   :  { %3918 = vrot.lane.b32.xlu0 %v5796_v11, %s6111_s24 }
0x1d7d   :  { %v3835_v13 = vpop.xlane.xlu0 %3834 }
0x1d7e   :  { %v3837_v43 = vmax.f32 %v3835_v13, 1e-30 }
0x1d80   :  { %5268 = vrcp.f32 %v3837_v43  ;;  %v4543_v43 = vld [vmem:[%s6091_s14 + $0xc0] sm:$0xff] }
0x1d81   :  { %v3919_v45 = vpop.permute.xlu0 %3918 }
0x1d82   :  { %4993 = vmatpush3.msra.mxu0 %v3919_v45  ;;  %v4545_v45 = vld [vmem:[%s6091_s14 + $0xd0] sm:$0xff] }
0x1d83   :  { %4997 = vmatprep.subr.mxu0 %v4485_v44 }
0x1d8a   :  { %v5269_v46 = vpop.eup %5268 }
0x1d8b   :  { %v3841_v47 = vmul.f32 %v5269_v46, %v5267_v34  ;;  %v4541_v34 = vld [vmem:[%s6091_s14 + $0xb0] sm:$0xff] }
0x1d8c   :  { %v5140_v13 = vpack.c.bf16 %v4542_v40, %v4541_v34 }
0x1d8d   :  { %4995 = vmatmul.mubr.msk.f32.vlgmr.msra.gmra.mrb[24].mxu0 %vm363_vm5, %v3841_v47  ;;  %v4546_v47 = vld [vmem:[%s6091_s14 + $0xd8] sm:$0xff] }
0x1d8e   :  { %4998 = vmatpush3.msra.mxu0 %v4485_v44  ;;  %v4544_v44 = vld [vmem:[%s6091_s14 + $0xc8] sm:$0xff] }
0x1d8f   :  { %5129 = vmatprep.subr.bf16.mxu0 %v5128_v31  ;;  %v5144_v46 = vpack.c.bf16 %v4544_v44, %v4543_v43  ;;  %v4555_v43 = vld [vmem:[%s6093_s16 + $0x1] ss:$0 sm:$0xff]  ;;  %s5282_s16 = scalar_lea.vmem %s4419_s8, 32 }
0x1d90   :  { %p5283_p0 = scmp.ne.s32.totalorder %s4419_s8, %s5282_s16  ;;  %p5288_p2 = scmp.lt.s32.totalorder %s5282_s16, %s5282_s16 }
0x1d92   :  { %p5289_p3 = por %p5288_p2, %p5287_p1 }
0x1d94   :  { %p5290_p4 = pnand %p5289_p3, %p5283_p0 }
0x1db8   :  { %v3914_v48 = vpop.f32.mrb[50].mxu1 }
0x1db9   :  { %v4991_v49 = vpop.f32.mrb[51].mxu1  ;;  %4999 = vmatprep.mubr.msk.f32.mxu0 %vm363_vm5, %v3914_v48  ;;  %v5148_v48 = vpack.c.bf16 %v4546_v47, %v4545_v45 }
0x1dba   :  { %v4547_v49 = vld [vmem:[%s6091_s14 + $0xe0] sm:$0xff] }
0x1e60   :  { %v3990_v11 = vpop.f32.mrb[24].mxu0 }
0x1e61   :  { %v4996_v50 = vpop.f32.mrb[25].mxu0  ;;  %5000 = vmatmul.mubr.msk.f32.vlgmr.msra.gmra.mrb[18].mxu0 %vm363_vm5, %v3990_v11  ;;  %v4548_v11 = vld [vmem:[%s6091_s14 + $0xe8] sm:$0xff] }
0x1e62   :  { %5131 = vmatpush3.bf16.msra.mxu0 %v5128_v31  ;;  %v5152_v50 = vpack.c.bf16 %v4548_v11, %v4547_v49 }
0x1e63   :  { %5133 = vmatprep.subr.bf16.mxu0 %v5132_v36 }
0x1e66   :  { %5135 = vmatpush3.bf16.msra.mxu0 %v5132_v36 }
0x1e67   :  { %5137 = vmatprep.subr.bf16.mxu0 %v5136_v39 }
0x1e6a   :  { %5139 = vmatpush3.bf16.msra.mxu0 %v5136_v39 }
0x1e6b   :  { %5141 = vmatprep.subr.bf16.mxu0 %v5140_v13 }
0x1e6e   :  { %5143 = vmatpush3.bf16.msra.mxu0 %v5140_v13 }
0x1e6f   :  { %5145 = vmatprep.subr.bf16.mxu0 %v5144_v46 }
0x1e72   :  { %5147 = vmatpush3.bf16.msra.mxu0 %v5144_v46 }
0x1e73   :  { %5149 = vmatprep.subr.bf16.mxu0 %v5148_v48 }
0x1e76   :  { %5151 = vmatpush3.bf16.msra.mxu0 %v5148_v48 }
0x1e77   :  { %5153 = vmatprep.subr.bf16.mxu0 %v5152_v50 }
0x1e7a   :  { %5155 = vmatpush3.bf16.msra.mxu0 %v5152_v50 }
0x1f34   :  { %v5001_v41 = vpop.f32.mrb[18].mxu0 }
0x1f35   :  { %v4086_v51 = vadd.f32 %v5001_v41, %v4522_v42  ;;  %v4066_v52 = vpop.f32.mrb[19].mxu0  ;;  %v4550_v41 = vld [vmem:[%s6091_s14 + $0xf8] sm:$0xff] }
0x1f36   :  { %v4085_v54 = vadd.f32 %v4522_v42, %v4066_v52  ;;  %v4549_v42 = vld [vmem:[%s6091_s14 + $0xf0] sm:$0xff]  ;;  %v4532_v52 = vld [vmem:[%s6090_s13 + $0x1] ss:$0 sm:$0xff] }
0x1f37   :  { %v4088_v22 = vadd.f32 %v4086_v51, %v5785_v8  ;;  %v5156_v51 = vpack.c.bf16 %v4550_v41, %v4549_v42 }
0x1f38   :  { %v4087_v55 = vadd.f32 %v4085_v54, %v5783_v4  ;;  %v4527_v4 = vld [vmem:[%s6089_s12 + $0x20] sm:$0xff] }
0x1f39   :  { %v4096_v56 = vsel %vm178_vm3, %v4088_v22, 0.0  ;;  %v5120_v6 = vpack.c.bf16 %v4528_v53, %v4527_v4  ;;  %5157 = vmatprep.subr.bf16.mxu0 %v5156_v51 }
0x1f3a   :  { %4097 = vadd.xlane.f32.xlu0 %v4096_v56  ;;  %v4093_v57 = vsel %vm178_vm3, %v4087_v55, 0.0  ;;  %5159 = vmatpush3.bf16.msra.mxu0 %v5156_v51 }
0x1f3b   :  { %4094 = vadd.xlane.f32.xlu1 %v4093_v57  ;;  %5121 = vmatprep.subr.bf16.mxu1 %v5120_v6 }
0x1f3c   :  { %5123 = vmatpush3.bf16.msra.mxu1 %v5120_v6 }
0x1f3d   :  { %5125 = vmatprep.subr.bf16.mxu1 %v5124_v10 }
0x1f40   :  { %5127 = vmatpush3.bf16.msra.mxu1 %v5124_v10 }
0x1fc7   :  { %v4098_v58 = vpop.xlane.xlu0 %4097 }
0x1fc8   :  { %v4100_v59 = vmul.f32 0.03125, %v4098_v58  ;;  %v4095_v61 = vpop.xlane.xlu1 %4094 }
0x1fc9   :  { %v4099_v62 = vmul.f32 0.03125, %v4095_v61 }
0x1fca   :  { %v4102_v63 = vsub.f32 %v4088_v22, %v4100_v59 }
0x1fcb   :  { %v4101_v20 = vsub.f32 %v4087_v55, %v4099_v62 }
0x1fcc   :  { %v4104_v0 = vmul.f32 %v4102_v63, %v4102_v63 }
0x1fcd   :  { %v4103_v3 = vmul.f32 %v4101_v20, %v4101_v20 }
0x1fce   :  { %v4108_v5 = vsel %vm178_vm3, %v4104_v0, 0.0 }
0x1fcf   :  { %4109 = vadd.xlane.f32.xlu0 %v4108_v5  ;;  %v4105_v8 = vsel %vm178_vm3, %v4103_v3, 0.0 }
0x1fd0   :  { %4106 = vadd.xlane.f32.xlu1 %v4105_v8 }
0x205c   :  { %v4110_v60 = vpop.xlane.xlu0 %4109 }
0x205d   :  { %v4112_v14 = vmul.f32 0.03125, %v4110_v60  ;;  %v4107_v16 = vpop.xlane.xlu1 %4106 }
0x205e   :  { %v4111_v17 = vmul.f32 0.03125, %v4107_v16 }
0x205f   :  { %v4114_v15 = vadd.f32 1e-12, %v4112_v14  ;;  %v4552_v14 = vld [vmem:[%s6092_s15 + $0x1] ss:$0 sm:$0xff] }
0x2060   :  { %v4113_v18 = vadd.f32 1e-12, %v4111_v17 }
0x2061   :  { %5270 = vrsqrt.f32 %v4114_v15 }
0x2062   :  { %5272 = vrsqrt.f32 %v4113_v18 }
0x206b   :  { %v5271_v19 = vpop.eup %5270 }
0x206c   :  { %v5273_v23 = vpop.eup %5272  ;;  %v4118_v24 = vmul.f32 %v5271_v19, %v4102_v63 }
0x206d   :  { %v4117_v25 = vmul.f32 %v5273_v23, %v4101_v20 }
0x206e   :  { %v4126_v27 = vmul.f32 %v4525_v21, %v4118_v24 }
0x206f   :  { %v4125_v28 = vmul.f32 %v4525_v21, %v4117_v25  ;;  %v5320_v25 = vmov 0  }
0x2070   :  { %v5991_v29 = vadd.f32 %v4526_v26, %v4126_v27  ;;  %5188 = vset.pattern.permute.xlu1 %v5320_v25  ;;  %5189 = vset.pattern.permute.xlu0 %v5320_v25 }
0x2071   :  { %v5989_v33 = vadd.f32 %v4526_v26, %v4125_v28 }
0x2073   :  { %5010 = vmatprep.mubr.msk.f32.mxu1 %vm178_vm3, %v5989_v33 }
0x2074   :  { %5011 = vmatmul.mubr.msk.f32.vlgmr.msra.gmra.mrb[52].mxu1 %vm178_vm3, %v5991_v29 }
0x2147   :  { %v5012_v54 = vpop.f32.mrb[52].mxu1 }
0x2148   :  { %v4226_v22 = vadd.f32 %v5012_v54, %v4532_v52  ;;  %v4220_v55 = vpop.f32.mrb[53].mxu1 }
0x2149   :  { %v4221_v56 = vadd.f32 %v4532_v52, %v4220_v55 }
0x214a   :  { %v4230_v57 = vmul.f32 %v4226_v22, %v4226_v22 }
0x214b   :  { %v4229_v58 = vmul.f32 %v4221_v56, %v4221_v56 }
0x214c   :  { %v4232_v59 = vmul.f32 %v4230_v57, %v4226_v22 }
0x214d   :  { %v4231_v61 = vmul.f32 %v4229_v58, %v4221_v56 }
0x214e   :  { %v4234_v62 = vmul.f32 0.044715, %v4232_v59 }
0x214f   :  { %v4233_v63 = vmul.f32 0.044715, %v4231_v61 }
0x2150   :  { %v4236_v20 = vadd.f32 %v4234_v62, %v4226_v22 }
0x2151   :  { %v4235_v0 = vadd.f32 %v4233_v63, %v4221_v56 }
0x2152   :  { %v4238_v3 = vmul.f32 0.7978846, %v4236_v20 }
0x2153   :  { %v4237_v5 = vmul.f32 0.7978846, %v4235_v0 }
0x2154   :  { %5274 = vtanh.f32 %v4238_v3 }
0x2155   :  { %5276 = vtanh.f32 %v4237_v5 }
0x215e   :  { %v5275_v8 = vpop.eup %5274 }
0x215f   :  { %v5277_v4 = vpop.eup %5276  ;;  %v4242_v53 = vadd.f32 1.0, %v5275_v8 }
0x2160   :  { %v4241_v6 = vadd.f32 1.0, %v5277_v4 }
0x2161   :  { %v4244_v7 = vmul.f32 0.5, %v4242_v53 }
0x2162   :  { %v4243_v9 = vmul.f32 0.5, %v4241_v6 }
0x2163   :  { %v4246_v60 = vmul.f32 %v4244_v7, %v4226_v22 }
0x2164   :  { %v4245_v10 = vmul.f32 %v4243_v9, %v4221_v56 }
0x2166   :  { %5045 = vmatprep.mubr.f32.mxu0 %v4245_v10 }
0x2167   :  { %5046 = vmatmul.mubr.f32.vlgmr.msra.gmra.mrb[26].mxu0 %v4246_v60 }
0x223a   :  { %v5047_v16 = vpop.f32.mrb[26].mxu0 }
0x223b   :  { %v4344_v17 = vadd.f32 %v5047_v16, %v4552_v14  ;;  %v4338_v15 = vpop.f32.mrb[27].mxu0 }
0x223c   :  { %v4339_v18 = vadd.f32 %v4552_v14, %v4338_v15 }
0x223d   :  { %v4348_v19 = vadd.f32 %v4344_v17, %v5991_v29 }
0x223e   :  { %v4347_v21 = vadd.f32 %v4339_v18, %v5989_v33 }
0x223f   :  { %v4356_v23 = vsel %vm178_vm3, %v4348_v19, 0.0 }
0x2240   :  { %4357 = vadd.xlane.f32.xlu1 %v4356_v23  ;;  %v4353_v24 = vsel %vm178_vm3, %v4347_v21, 0.0 }
0x2241   :  { %4354 = vadd.xlane.f32.xlu0 %v4353_v24 }
0x22cd   :  { %v4358_v26 = vpop.xlane.xlu1 %4357 }
0x22ce   :  { %v4360_v27 = vmul.f32 0.03125, %v4358_v26  ;;  %v4355_v28 = vpop.xlane.xlu0 %4354 }
0x22cf   :  { %v4359_v30 = vmul.f32 0.03125, %v4355_v28 }
0x22d0   :  { %v4362_v12 = vsub.f32 %v4348_v19, %v4360_v27 }
0x22d1   :  { %v4361_v31 = vsub.f32 %v4347_v21, %v4359_v30 }
0x22d2   :  { %v4364_v32 = vmul.f32 %v4362_v12, %v4362_v12 }
0x22d3   :  { %v4363_v35 = vmul.f32 %v4361_v31, %v4361_v31 }
0x22d4   :  { %v4368_v29 = vsel %vm178_vm3, %v4364_v32, 0.0 }
0x22d5   :  { %4369 = vadd.xlane.f32.xlu1 %v4368_v29  ;;  %v4365_v33 = vsel %vm178_vm3, %v4363_v35, 0.0 }
0x22d6   :  { %4366 = vadd.xlane.f32.xlu0 %v4365_v33 }
0x22e6   :  { %4397 = vperm.xlu1 %5188, %v223_v2  }
0x2362   :  { %v4370_v36 = vpop.xlane.xlu1 %4369 }
0x2363   :  { %v4372_v37 = vmul.f32 0.03125, %v4370_v36  ;;  %v4367_v38 = vpop.xlane.xlu0 %4366 }
0x2364   :  { %v4371_v39 = vmul.f32 0.03125, %v4367_v38 }
0x2365   :  { %v4374_v34 = vadd.f32 1e-12, %v4372_v37 }
0x2366   :  { %v4373_v40 = vadd.f32 1e-12, %v4371_v39  ;;  %v4398_v44 = vpop.permute.xlu1 %4397 }
0x2367   :  { %5278 = vrsqrt.f32 %v4374_v34  ;;  %v4399_v48 = vrot.slane %v4398_v44, 1 }
0x2368   :  { %5280 = vrsqrt.f32 %v4373_v40 }
0x2371   :  { %v5279_v13 = vpop.eup %5278 }
0x2372   :  { %v5281_v45 = vpop.eup %5280  ;;  %v4378_v46 = vmul.f32 %v5279_v13, %v4362_v12 }
0x2373   :  { %v4377_v2 = vmul.f32 %v5281_v45, %v4361_v31 }
0x2374   :  { %v4386_v47 = vmul.f32 %v4555_v43, %v4378_v46 }
0x2375   :  { %v4385_v49 = vmul.f32 %v4555_v43, %v4377_v2 }
0x2376   :  { %v4394_v11 = vadd.f32 %v4556_v1, %v4386_v47 }
0x2377   :  { %v4393_v50 = vadd.f32 %v4556_v1, %v4385_v49 }
0x2378   :  { %v4403_v42 = vmul.f32 %v4399_v48, %v4394_v11 }
0x2379   :  { %v4402_v41 = vmul.f32 %v4398_v44, %v4393_v50 }
0x237a   :  { %v4406_v51 = vrot.slane %v4403_v42, 7 }
0x237c   :  { %v4408_v52 = vsel %vm4407_vm6, %v4406_v51, %v4402_v41 }
0x237d   :  { %4411 = vst.msk [vmem:[#allocation2] sm:$0x3] %vm4410_vm7, %v4408_v52 }
0x237e   :  { %5293 = shalt.err (!%p5290_p4)
}
0x237f   :  { %s5294_s0 = scalar_lea.hbm %s6095_s18, 32 }
0x2380   :  { %p5295_p5 = scmp.ne.s32.totalorder %s6095_s18, %s5294_s0  ;;  %p5298_p6 = scmp.lt.u32.totalorder %s5294_s0, %s6095_s18 }
0x2382   :  { %p5300_p7 = pnand %p5298_p6, %p5295_p5 }
0x2384   :  { %5303 = shalt.err (!%p5300_p7)
}
0x2385   :  { %4421 = dma.vmem_to_hbm [thread:$0]  %s4419_s8, 32, %s6095_s18, [#allocation3]  }
0x2386   :  { %5304 = dma.done.wait [#allocation3], 32  }
0x2387   :  { %5305 = vsyncadd [#allocation3], 4294967264 }
0x2388   :  { %4425 = vsyncpa [#allocation3], 1 }

</bundles_post_ra>
